<compile_context>
chip_gen: v7x
topology: tpu7x:2x2x1
jax: 0.10.0
libtpu: 0.0.40
codegen_flags: <defaults>
</compile_context>

<pallas_src>
import functools

import jax
import jax.numpy as jnp
from jax.experimental import pallas as pl
from jax.experimental.pallas import tpu as pltpu

# ---- model hyperparameters (small, consistent with the module) ----
VOCAB_SIZE = 32
EMBED_SIZE = 32
LSTM_SIZE = 32
SEQ_LENGTH = 8       # must be even so that view(-1, lstm_size*2) is well-formed
NUM_LAYERS = 2
BATCH = 2


# ---------------------------------------------------------------------------
# Fused kernel: embedding gather + both LSTM layers (interleaved, time loop
# unrolled) + FC on the last timestep pair.
# PyTorch gate order: i, f, g, o ;  c' = f*c + i*g ; h' = o*tanh(c')
# ---------------------------------------------------------------------------
def _fused_forward_kernel(idx_ref,                    # SMEM (T*B,) int32, time-major tokens
                          h0_ref, c0_ref,             # (L, B, H) initial hidden/cell
                          emb_gate_ref,               # (VOCAB, 4H)  = Emb @ Wih0^T + b0
                          whh0_ref,                   # (H, 4H)
                          wih1_ref, whh1_ref, b1_ref, # (H, 4H), (H, 4H), (1, 4H)
                          fcw0_ref, fcw1_ref, fcb_ref,# (H, V), (H, V), (1, V)
                          out_ref,                    # (B, V)
                          hn_ref, cn_ref,             # (L, B, H)
                          *, seq_len, batch, hidden_size):
    T, B, H = seq_len, batch, hidden_size

    # Weights loaded once, stay resident for the whole (unrolled) recurrence.
    whh0 = whh0_ref[...]
    wih1 = wih1_ref[...]
    whh1 = whh1_ref[...]
    b1 = b1_ref[...]

    h0 = h0_ref[0]
    c0 = c0_ref[0]
    h1 = h0_ref[1]
    c1 = c0_ref[1]

    def lstm_cell(gates, c):
        # Full-vreg EUP passes over the (B, 4H) gate slab, then lane-slice per gate.
        sig = jax.nn.sigmoid(gates)
        tnh = jnp.tanh(gates)
        i_g = sig[:, 0 * H:1 * H]
        f_g = sig[:, 1 * H:2 * H]
        g_g = tnh[:, 2 * H:3 * H]
        o_g = sig[:, 3 * H:4 * H]
        c_new = f_g * c + i_g * g_g
        h_new = o_g * jnp.tanh(c_new)
        return h_new, c_new

    fc_acc = fcb_ref[...]                              # (1, V), broadcasts to (B, V)

    for t in range(T):                                 # fully unrolled recurrence
        # Layer-0 input projection == gather of the pre-fused (Emb @ Wih0^T + b0) table.
        # Off the recurrence critical path: depends only on SMEM token ids.
        rows = [emb_gate_ref[pl.ds(idx_ref[t * B + b], 1), :] for b in range(B)]
        xp0_t = jnp.concatenate(rows, axis=0) if B > 1 else rows[0]   # (B, 4H)

        # --- layer 0, step t ---
        g0 = xp0_t + jnp.dot(h0, whh0, preferred_element_type=jnp.float32)
        h0, c0 = lstm_cell(g0, c0)

        # --- layer 1, step t (consumes layer-0 output of the SAME timestep) ---
        # TODO(synk): inter-layer dropout (p=0.5) omitted — identity in eval mode.
        g1 = (jnp.dot(h0, wih1, preferred_element_type=jnp.float32)
              + jnp.dot(h1, whh1, preferred_element_type=jnp.float32) + b1)
        h1, c1 = lstm_cell(g1, c1)

        # FC epilogue: output[:, -1] of the PyTorch view(-1, 2H) pairing is
        # fc(concat(h1[T-2], h1[T-1])).  Split weights -> no lane concat, and the
        # T-2 contribution overlaps the final recurrence step.
        if t == T - 2:
            fc_acc = fc_acc + jnp.dot(h1, fcw0_ref[...],
                                      preferred_element_type=jnp.float32)
        if t == T - 1:
            fc_acc = fc_acc + jnp.dot(h1, fcw1_ref[...],
                                      preferred_element_type=jnp.float32)

    # Final states written exactly once per layer.
    hn_ref[0] = h0
    cn_ref[0] = c0
    hn_ref[1] = h1
    cn_ref[1] = c1
    out_ref[...] = fc_acc


def _fused_call(idx_flat, h0, c0, params):
    assert NUM_LAYERS == 2, "fused kernel is written for exactly 2 LSTM layers"
    L, B, H = h0.shape
    T = idx_flat.shape[0] // B
    V = params["fc_b"].shape[-1]
    assert T >= 2 and T % 2 == 0

    kernel = functools.partial(_fused_forward_kernel,
                               seq_len=T, batch=B, hidden_size=H)
    vmem = pl.BlockSpec(memory_space=pltpu.MemorySpace.VMEM)
    smem = pl.BlockSpec(memory_space=pltpu.MemorySpace.SMEM)

    args = [idx_flat, h0, c0,
            params["emb_gate_0"], params["whh_t_0"],
            params["wih_t_1"], params["whh_t_1"], params["b_1"],
            params["fc_wt_lo"], params["fc_wt_hi"], params["fc_b"]]

    out, hn, cn = pl.pallas_call(
        kernel,
        in_specs=[smem] + [vmem] * (len(args) - 1),
        out_specs=[vmem, vmem, vmem],
        out_shape=(jax.ShapeDtypeStruct((B, V), jnp.float32),
                   jax.ShapeDtypeStruct((L, B, H), jnp.float32),
                   jax.ShapeDtypeStruct((L, B, H), jnp.float32)),
    )(*args)
    return out, hn, cn


# ---------------------------------------------------------------------------
# Parameter init (deterministic, synthetic). Weights stored pre-transposed,
# biases pre-combined and the embedding pre-folded into the layer-0 gate table
# so the forward pass does zero wrapper-side glue on parameters.
# ---------------------------------------------------------------------------
def init_params(key):
    params = {}
    key, k = jax.random.split(key)
    params["embedding"] = jax.random.normal(k, (VOCAB_SIZE, EMBED_SIZE),
                                            jnp.float32) * 0.1
    for l in range(NUM_LAYERS):
        in_size = EMBED_SIZE if l == 0 else LSTM_SIZE
        key, k1, k2, k3, k4 = jax.random.split(key, 5)
        wih = jax.random.normal(k1, (4 * LSTM_SIZE, in_size), jnp.float32) * 0.1
        whh = jax.random.normal(k2, (4 * LSTM_SIZE, LSTM_SIZE), jnp.float32) * 0.1
        bih = jax.random.normal(k3, (4 * LSTM_SIZE,), jnp.float32) * 0.1
        bhh = jax.random.normal(k4, (4 * LSTM_SIZE,), jnp.float32) * 0.1
        params[f"wih_t_{l}"] = jnp.transpose(wih)            # (in, 4H)
        params[f"whh_t_{l}"] = jnp.transpose(whh)            # (H, 4H)
        params[f"b_{l}"] = (bih + bhh)[None, :]              # (1, 4H)
    key, k1, k2 = jax.random.split(key, 3)
    fc_w = jax.random.normal(k1, (VOCAB_SIZE, LSTM_SIZE * 2), jnp.float32) * 0.1
    fc_b = jax.random.normal(k2, (VOCAB_SIZE,), jnp.float32) * 0.1
    params["fc_wt"] = jnp.transpose(fc_w)                    # (2H, V)
    params["fc_b"] = fc_b[None, :]                           # (1, V)

    # --- one-time fusions consumed by the kernel ---
    # Embedding -> layer-0 input projection folded into a (VOCAB, 4H) gate table.
    params["emb_gate_0"] = (jnp.dot(params["embedding"], params["wih_t_0"],
                                    precision=jax.lax.Precision.HIGHEST)
                            + params["b_0"])
    # FC weight split for the (h_{T-2}, h_{T-1}) pair (avoids an in-kernel lane concat).
    params["fc_wt_lo"] = params["fc_wt"][:LSTM_SIZE]          # (H, V)
    params["fc_wt_hi"] = params["fc_wt"][LSTM_SIZE:]          # (H, V)
    return params


# ---------------------------------------------------------------------------
# Forward pass
# ---------------------------------------------------------------------------
@jax.jit
def machine_sponge_forward(params, batch, hidden):
    """batch: (B, T) int32 tokens; hidden: ((L, B, H), (L, B, H))."""
    h0, c0 = hidden
    B, T = batch.shape
    assert T % 2 == 0, "seq_length must be even for the view(-1, 2H) pairing"

    # Only wrapper glue: time-major flatten of the int32 token ids (cheap).
    idx_flat = jnp.transpose(batch).reshape(T * B).astype(jnp.int32)

    out, hn, cn = _fused_call(idx_flat, h0, c0, params)
    return out, (hn, cn)


# ---------------------------------------------------------------------------
# Pure-JAX reference (follows the PyTorch code path exactly, incl. full FC+view)
# ---------------------------------------------------------------------------
def reference_forward(params, batch, hidden):
    h0, c0 = hidden
    B, T = batch.shape
    hp = jax.lax.Precision.HIGHEST
    embeds = jnp.take(params["embedding"], batch, axis=0)            # (B, T, E)
    x = jnp.transpose(embeds, (1, 0, 2)).astype(jnp.float32)         # (T, B, E)
    hn_list, cn_list = [], []
    H = LSTM_SIZE
    for l in range(NUM_LAYERS):
        wih_t = params[f"wih_t_{l}"]
        whh_t = params[f"whh_t_{l}"]
        b = params[f"b_{l}"]
        h, c = h0[l], c0[l]
        outs = []
        for t in range(T):
            gates = (jnp.dot(x[t], wih_t, precision=hp)
                     + jnp.dot(h, whh_t, precision=hp) + b)
            i_g = jax.nn.sigmoid(gates[:, 0 * H:1 * H])
            f_g = jax.nn.sigmoid(gates[:, 1 * H:2 * H])
            g_g = jnp.tanh(gates[:, 2 * H:3 * H])
            o_g = jax.nn.sigmoid(gates[:, 3 * H:4 * H])
            c = f_g * c + i_g * g_g
            h = o_g * jnp.tanh(c)
            outs.append(h)
        x = jnp.stack(outs, axis=0)                                  # (T, B, H)
        hn_list.append(h)
        cn_list.append(c)
    lstm_out = jnp.transpose(x, (1, 0, 2))                           # (B, T, H)
    flat = lstm_out.reshape(-1, 2 * LSTM_SIZE)
    out_all = jnp.dot(flat, params["fc_wt"], precision=hp) + params["fc_b"]
    out = out_all.reshape(B, -1, VOCAB_SIZE)[:, -1]
    return out, (jnp.stack(hn_list, axis=0), jnp.stack(cn_list, axis=0))


if __name__ == "__main__":
    key = jax.random.PRNGKey(0)
    key, pkey, bkey = jax.random.split(key, 3)

    params = init_params(pkey)
    batch = jax.random.randint(bkey, (BATCH, SEQ_LENGTH), 0, VOCAB_SIZE,
                               dtype=jnp.int32)
    hidden = (jnp.zeros((NUM_LAYERS, BATCH, LSTM_SIZE), jnp.float32),
              jnp.zeros((NUM_LAYERS, BATCH, LSTM_SIZE), jnp.float32))

    out, (h_n, c_n) = machine_sponge_forward(params, batch, hidden)
    jax.block_until_ready((out, h_n, c_n))

    assert out.shape == (BATCH, VOCAB_SIZE)
    assert h_n.shape == (NUM_LAYERS, BATCH, LSTM_SIZE)
    assert c_n.shape == (NUM_LAYERS, BATCH, LSTM_SIZE)

    # Numerical sanity check against a pure-JAX reference of the PyTorch path.
    ref_out, (ref_h, ref_c) = reference_forward(params, batch, hidden)
    assert jnp.allclose(out, ref_out, atol=5e-3, rtol=5e-3)
    assert jnp.allclose(h_n, ref_h, atol=5e-3, rtol=5e-3)
    assert jnp.allclose(c_n, ref_c, atol=5e-3, rtol=5e-3)

    print("KERNEL_OK")
</pallas_src>

<mosaic_0001>
module attributes {stable_mosaic.version = 11 : i64} {
  func.func @_fused_forward_kernel(%arg0: memref<16xi32, #tpu.memory_space<smem>>, %arg1: memref<2x2x32xf32, #tpu.memory_space<vmem>>, %arg2: memref<2x2x32xf32, #tpu.memory_space<vmem>>, %arg3: memref<32x128xf32, #tpu.memory_space<vmem>>, %arg4: memref<32x128xf32, #tpu.memory_space<vmem>>, %arg5: memref<32x128xf32, #tpu.memory_space<vmem>>, %arg6: memref<32x128xf32, #tpu.memory_space<vmem>>, %arg7: memref<1x128xf32, #tpu.memory_space<vmem>>, %arg8: memref<32x32xf32, #tpu.memory_space<vmem>>, %arg9: memref<32x32xf32, #tpu.memory_space<vmem>>, %arg10: memref<1x32xf32, #tpu.memory_space<vmem>>, %arg11: memref<2x32xf32, #tpu.memory_space<vmem>>, %arg12: memref<2x2x32xf32, #tpu.memory_space<vmem>>, %arg13: memref<2x2x32xf32, #tpu.memory_space<vmem>>) attributes {dimension_semantics = [], scalar_prefetch = 0 : i64, scratch_operands = 0 : i64, tpu.core_type = #tpu.core_type<tc>} {
    %c0 = arith.constant 0 : index
    %c0_0 = arith.constant 0 : index
    %0 = vector.load %arg4[%c0, %c0_0] : memref<32x128xf32, #tpu.memory_space<vmem>>, vector<32x128xf32>
    %c0_1 = arith.constant 0 : index
    %c0_2 = arith.constant 0 : index
    %1 = vector.load %arg5[%c0_1, %c0_2] : memref<32x128xf32, #tpu.memory_space<vmem>>, vector<32x128xf32>
    %c0_3 = arith.constant 0 : index
    %c0_4 = arith.constant 0 : index
    %2 = vector.load %arg6[%c0_3, %c0_4] : memref<32x128xf32, #tpu.memory_space<vmem>>, vector<32x128xf32>
    %c0_5 = arith.constant 0 : index
    %c0_6 = arith.constant 0 : index
    %3 = vector.load %arg7[%c0_5, %c0_6] : memref<1x128xf32, #tpu.memory_space<vmem>>, vector<1x128xf32>
    %c0_7 = arith.constant 0 : index
    %c0_8 = arith.constant 0 : index
    %c0_9 = arith.constant 0 : index
    %4 = vector.load %arg1[%c0_7, %c0_8, %c0_9] : memref<2x2x32xf32, #tpu.memory_space<vmem>>, vector<1x2x32xf32>
    %5 = vector.shape_cast %4 : vector<1x2x32xf32> to vector<2x32xf32>
    %c0_10 = arith.constant 0 : index
    %c0_11 = arith.constant 0 : index
    %c0_12 = arith.constant 0 : index
    %6 = vector.load %arg2[%c0_10, %c0_11, %c0_12] : memref<2x2x32xf32, #tpu.memory_space<vmem>>, vector<1x2x32xf32>
    %7 = vector.shape_cast %6 : vector<1x2x32xf32> to vector<2x32xf32>
    %c1 = arith.constant 1 : index
    %c0_13 = arith.constant 0 : index
    %c0_14 = arith.constant 0 : index
    %8 = vector.load %arg1[%c1, %c0_13, %c0_14] : memref<2x2x32xf32, #tpu.memory_space<vmem>>, vector<1x2x32xf32>
    %9 = vector.shape_cast %8 : vector<1x2x32xf32> to vector<2x32xf32>
    %c1_15 = arith.constant 1 : index
    %c0_16 = arith.constant 0 : index
    %c0_17 = arith.constant 0 : index
    %10 = vector.load %arg2[%c1_15, %c0_16, %c0_17] : memref<2x2x32xf32, #tpu.memory_space<vmem>>, vector<1x2x32xf32>
    %11 = vector.shape_cast %10 : vector<1x2x32xf32> to vector<2x32xf32>
    %c0_18 = arith.constant 0 : index
    %c0_19 = arith.constant 0 : index
    %12 = vector.load %arg10[%c0_18, %c0_19] : memref<1x32xf32, #tpu.memory_space<vmem>>, vector<1x32xf32>
    %c0_20 = arith.constant 0 : index
    %13 = memref.load %arg0[%c0_20] : memref<16xi32, #tpu.memory_space<smem>>
    %14 = arith.index_cast %13 : i32 to index
    %c0_21 = arith.constant 0 : index
    %15 = vector.load %arg3[%14, %c0_21] : memref<32x128xf32, #tpu.memory_space<vmem>>, vector<1x128xf32>
    %c1_22 = arith.constant 1 : index
    %16 = memref.load %arg0[%c1_22] : memref<16xi32, #tpu.memory_space<smem>>
    %17 = arith.index_cast %16 : i32 to index
    %c0_23 = arith.constant 0 : index
    %18 = vector.load %arg3[%17, %c0_23] : memref<32x128xf32, #tpu.memory_space<vmem>>, vector<1x128xf32>
    %19 = tpu.concatenate %15, %18 in 0 : vector<1x128xf32>, vector<1x128xf32> -> vector<2x128xf32>
    %cst = arith.constant dense<0.000000e+00> : vector<2x128xf32>
    %20 = tpu.matmul %5, %0, %cst {dimension_numbers = #tpu.dot_dimension_numbers<[1], [0], [0], [1], [0, 0, 1, 1], [], []>} : vector<2x32xf32>, vector<32x128xf32>, vector<2x128xf32> -> vector<2x128xf32>
    %21 = arith.addf %19, %20 : vector<2x128xf32>
    %22 = arith.negf %21 : vector<2x128xf32>
    %23 = math.exp %22 : vector<2x128xf32>
    %cst_24 = arith.constant 1.000000e+00 : f32
    %24 = vector.broadcast %cst_24 : f32 to vector<2x128xf32>
    %25 = arith.addf %24, %23 : vector<2x128xf32>
    %26 = arith.divf %24, %25 : vector<2x128xf32>
    %27 = math.tanh %21 : vector<2x128xf32>
    %28 = vector.extract_strided_slice %26 {offsets = [0, 0], sizes = [2, 32], strides = [1, 1]} : vector<2x128xf32> to vector<2x32xf32>
    %29 = vector.extract_strided_slice %26 {offsets = [0, 32], sizes = [2, 32], strides = [1, 1]} : vector<2x128xf32> to vector<2x32xf32>
    %30 = vector.extract_strided_slice %27 {offsets = [0, 64], sizes = [2, 32], strides = [1, 1]} : vector<2x128xf32> to vector<2x32xf32>
    %31 = vector.extract_strided_slice %26 {offsets = [0, 96], sizes = [2, 32], strides = [1, 1]} : vector<2x128xf32> to vector<2x32xf32>
    %32 = arith.mulf %29, %7 : vector<2x32xf32>
    %33 = arith.mulf %28, %30 : vector<2x32xf32>
    %34 = arith.addf %32, %33 : vector<2x32xf32>
    %35 = math.tanh %34 : vector<2x32xf32>
    %36 = arith.mulf %31, %35 : vector<2x32xf32>
    %cst_25 = arith.constant dense<0.000000e+00> : vector<2x128xf32>
    %37 = tpu.matmul %36, %1, %cst_25 {dimension_numbers = #tpu.dot_dimension_numbers<[1], [0], [0], [1], [0, 0, 1, 1], [], []>} : vector<2x32xf32>, vector<32x128xf32>, vector<2x128xf32> -> vector<2x128xf32>
    %cst_26 = arith.constant dense<0.000000e+00> : vector<2x128xf32>
    %38 = tpu.matmul %9, %2, %cst_26 {dimension_numbers = #tpu.dot_dimension_numbers<[1], [0], [0], [1], [0, 0, 1, 1], [], []>} : vector<2x32xf32>, vector<32x128xf32>, vector<2x128xf32> -> vector<2x128xf32>
    %39 = arith.addf %37, %38 : vector<2x128xf32>
    %40 = vector.broadcast %3 : vector<1x128xf32> to vector<2x128xf32>
    %41 = arith.addf %39, %40 : vector<2x128xf32>
    %42 = arith.negf %41 : vector<2x128xf32>
    %43 = math.exp %42 : vector<2x128xf32>
    %cst_27 = arith.constant 1.000000e+00 : f32
    %44 = vector.broadcast %cst_27 : f32 to vector<2x128xf32>
    %45 = arith.addf %44, %43 : vector<2x128xf32>
    %46 = arith.divf %44, %45 : vector<2x128xf32>
    %47 = math.tanh %41 : vector<2x128xf32>
    %48 = vector.extract_strided_slice %46 {offsets = [0, 0], sizes = [2, 32], strides = [1, 1]} : vector<2x128xf32> to vector<2x32xf32>
    %49 = vector.extract_strided_slice %46 {offsets = [0, 32], sizes = [2, 32], strides = [1, 1]} : vector<2x128xf32> to vector<2x32xf32>
    %50 = vector.extract_strided_slice %47 {offsets = [0, 64], sizes = [2, 32], strides = [1, 1]} : vector<2x128xf32> to vector<2x32xf32>
    %51 = vector.extract_strided_slice %46 {offsets = [0, 96], sizes = [2, 32], strides = [1, 1]} : vector<2x128xf32> to vector<2x32xf32>
    %52 = arith.mulf %49, %11 : vector<2x32xf32>
    %53 = arith.mulf %48, %50 : vector<2x32xf32>
    %54 = arith.addf %52, %53 : vector<2x32xf32>
    %55 = math.tanh %54 : vector<2x32xf32>
    %56 = arith.mulf %51, %55 : vector<2x32xf32>
    %c2 = arith.constant 2 : index
    %57 = memref.load %arg0[%c2] : memref<16xi32, #tpu.memory_space<smem>>
    %58 = arith.index_cast %57 : i32 to index
    %c0_28 = arith.constant 0 : index
    %59 = vector.load %arg3[%58, %c0_28] : memref<32x128xf32, #tpu.memory_space<vmem>>, vector<1x128xf32>
    %c3 = arith.constant 3 : index
    %60 = memref.load %arg0[%c3] : memref<16xi32, #tpu.memory_space<smem>>
    %61 = arith.index_cast %60 : i32 to index
    %c0_29 = arith.constant 0 : index
    %62 = vector.load %arg3[%61, %c0_29] : memref<32x128xf32, #tpu.memory_space<vmem>>, vector<1x128xf32>
    %63 = tpu.concatenate %59, %62 in 0 : vector<1x128xf32>, vector<1x128xf32> -> vector<2x128xf32>
    %cst_30 = arith.constant dense<0.000000e+00> : vector<2x128xf32>
    %64 = tpu.matmul %36, %0, %cst_30 {dimension_numbers = #tpu.dot_dimension_numbers<[1], [0], [0], [1], [0, 0, 1, 1], [], []>} : vector<2x32xf32>, vector<32x128xf32>, vector<2x128xf32> -> vector<2x128xf32>
    %65 = arith.addf %63, %64 : vector<2x128xf32>
    %66 = arith.negf %65 : vector<2x128xf32>
    %67 = math.exp %66 : vector<2x128xf32>
    %cst_31 = arith.constant 1.000000e+00 : f32
    %68 = vector.broadcast %cst_31 : f32 to vector<2x128xf32>
    %69 = arith.addf %68, %67 : vector<2x128xf32>
    %70 = arith.divf %68, %69 : vector<2x128xf32>
    %71 = math.tanh %65 : vector<2x128xf32>
    %72 = vector.extract_strided_slice %70 {offsets = [0, 0], sizes = [2, 32], strides = [1, 1]} : vector<2x128xf32> to vector<2x32xf32>
    %73 = vector.extract_strided_slice %70 {offsets = [0, 32], sizes = [2, 32], strides = [1, 1]} : vector<2x128xf32> to vector<2x32xf32>
    %74 = vector.extract_strided_slice %71 {offsets = [0, 64], sizes = [2, 32], strides = [1, 1]} : vector<2x128xf32> to vector<2x32xf32>
    %75 = vector.extract_strided_slice %70 {offsets = [0, 96], sizes = [2, 32], strides = [1, 1]} : vector<2x128xf32> to vector<2x32xf32>
    %76 = arith.mulf %73, %34 : vector<2x32xf32>
    %77 = arith.mulf %72, %74 : vector<2x32xf32>
    %78 = arith.addf %76, %77 : vector<2x32xf32>
    %79 = math.tanh %78 : vector<2x32xf32>
    %80 = arith.mulf %75, %79 : vector<2x32xf32>
    %cst_32 = arith.constant dense<0.000000e+00> : vector<2x128xf32>
    %81 = tpu.matmul %80, %1, %cst_32 {dimension_numbers = #tpu.dot_dimension_numbers<[1], [0], [0], [1], [0, 0, 1, 1], [], []>} : vector<2x32xf32>, vector<32x128xf32>, vector<2x128xf32> -> vector<2x128xf32>
    %cst_33 = arith.constant dense<0.000000e+00> : vector<2x128xf32>
    %82 = tpu.matmul %56, %2, %cst_33 {dimension_numbers = #tpu.dot_dimension_numbers<[1], [0], [0], [1], [0, 0, 1, 1], [], []>} : vector<2x32xf32>, vector<32x128xf32>, vector<2x128xf32> -> vector<2x128xf32>
    %83 = arith.addf %81, %82 : vector<2x128xf32>
    %84 = vector.broadcast %3 : vector<1x128xf32> to vector<2x128xf32>
    %85 = arith.addf %83, %84 : vector<2x128xf32>
    %86 = arith.negf %85 : vector<2x128xf32>
    %87 = math.exp %86 : vector<2x128xf32>
    %cst_34 = arith.constant 1.000000e+00 : f32
    %88 = vector.broadcast %cst_34 : f32 to vector<2x128xf32>
    %89 = arith.addf %88, %87 : vector<2x128xf32>
    %90 = arith.divf %88, %89 : vector<2x128xf32>
    %91 = math.tanh %85 : vector<2x128xf32>
    %92 = vector.extract_strided_slice %90 {offsets = [0, 0], sizes = [2, 32], strides = [1, 1]} : vector<2x128xf32> to vector<2x32xf32>
    %93 = vector.extract_strided_slice %90 {offsets = [0, 32], sizes = [2, 32], strides = [1, 1]} : vector<2x128xf32> to vector<2x32xf32>
    %94 = vector.extract_strided_slice %91 {offsets = [0, 64], sizes = [2, 32], strides = [1, 1]} : vector<2x128xf32> to vector<2x32xf32>
    %95 = vector.extract_strided_slice %90 {offsets = [0, 96], sizes = [2, 32], strides = [1, 1]} : vector<2x128xf32> to vector<2x32xf32>
    %96 = arith.mulf %93, %54 : vector<2x32xf32>
    %97 = arith.mulf %92, %94 : vector<2x32xf32>
    %98 = arith.addf %96, %97 : vector<2x32xf32>
    %99 = math.tanh %98 : vector<2x32xf32>
    %100 = arith.mulf %95, %99 : vector<2x32xf32>
    %c4 = arith.constant 4 : index
    %101 = memref.load %arg0[%c4] : memref<16xi32, #tpu.memory_space<smem>>
    %102 = arith.index_cast %101 : i32 to index
    %c0_35 = arith.constant 0 : index
    %103 = vector.load %arg3[%102, %c0_35] : memref<32x128xf32, #tpu.memory_space<vmem>>, vector<1x128xf32>
    %c5 = arith.constant 5 : index
    %104 = memref.load %arg0[%c5] : memref<16xi32, #tpu.memory_space<smem>>
    %105 = arith.index_cast %104 : i32 to index
    %c0_36 = arith.constant 0 : index
    %106 = vector.load %arg3[%105, %c0_36] : memref<32x128xf32, #tpu.memory_space<vmem>>, vector<1x128xf32>
    %107 = tpu.concatenate %103, %106 in 0 : vector<1x128xf32>, vector<1x128xf32> -> vector<2x128xf32>
    %cst_37 = arith.constant dense<0.000000e+00> : vector<2x128xf32>
    %108 = tpu.matmul %80, %0, %cst_37 {dimension_numbers = #tpu.dot_dimension_numbers<[1], [0], [0], [1], [0, 0, 1, 1], [], []>} : vector<2x32xf32>, vector<32x128xf32>, vector<2x128xf32> -> vector<2x128xf32>
    %109 = arith.addf %107, %108 : vector<2x128xf32>
    %110 = arith.negf %109 : vector<2x128xf32>
    %111 = math.exp %110 : vector<2x128xf32>
    %cst_38 = arith.constant 1.000000e+00 : f32
    %112 = vector.broadcast %cst_38 : f32 to vector<2x128xf32>
    %113 = arith.addf %112, %111 : vector<2x128xf32>
    %114 = arith.divf %112, %113 : vector<2x128xf32>
    %115 = math.tanh %109 : vector<2x128xf32>
    %116 = vector.extract_strided_slice %114 {offsets = [0, 0], sizes = [2, 32], strides = [1, 1]} : vector<2x128xf32> to vector<2x32xf32>
    %117 = vector.extract_strided_slice %114 {offsets = [0, 32], sizes = [2, 32], strides = [1, 1]} : vector<2x128xf32> to vector<2x32xf32>
    %118 = vector.extract_strided_slice %115 {offsets = [0, 64], sizes = [2, 32], strides = [1, 1]} : vector<2x128xf32> to vector<2x32xf32>
    %119 = vector.extract_strided_slice %114 {offsets = [0, 96], sizes = [2, 32], strides = [1, 1]} : vector<2x128xf32> to vector<2x32xf32>
    %120 = arith.mulf %117, %78 : vector<2x32xf32>
    %121 = arith.mulf %116, %118 : vector<2x32xf32>
    %122 = arith.addf %120, %121 : vector<2x32xf32>
    %123 = math.tanh %122 : vector<2x32xf32>
    %124 = arith.mulf %119, %123 : vector<2x32xf32>
    %cst_39 = arith.constant dense<0.000000e+00> : vector<2x128xf32>
    %125 = tpu.matmul %124, %1, %cst_39 {dimension_numbers = #tpu.dot_dimension_numbers<[1], [0], [0], [1], [0, 0, 1, 1], [], []>} : vector<2x32xf32>, vector<32x128xf32>, vector<2x128xf32> -> vector<2x128xf32>
    %cst_40 = arith.constant dense<0.000000e+00> : vector<2x128xf32>
    %126 = tpu.matmul %100, %2, %cst_40 {dimension_numbers = #tpu.dot_dimension_numbers<[1], [0], [0], [1], [0, 0, 1, 1], [], []>} : vector<2x32xf32>, vector<32x128xf32>, vector<2x128xf32> -> vector<2x128xf32>
    %127 = arith.addf %125, %126 : vector<2x128xf32>
    %128 = vector.broadcast %3 : vector<1x128xf32> to vector<2x128xf32>
    %129 = arith.addf %127, %128 : vector<2x128xf32>
    %130 = arith.negf %129 : vector<2x128xf32>
    %131 = math.exp %130 : vector<2x128xf32>
    %cst_41 = arith.constant 1.000000e+00 : f32
    %132 = vector.broadcast %cst_41 : f32 to vector<2x128xf32>
    %133 = arith.addf %132, %131 : vector<2x128xf32>
    %134 = arith.divf %132, %133 : vector<2x128xf32>
    %135 = math.tanh %129 : vector<2x128xf32>
    %136 = vector.extract_strided_slice %134 {offsets = [0, 0], sizes = [2, 32], strides = [1, 1]} : vector<2x128xf32> to vector<2x32xf32>
    %137 = vector.extract_strided_slice %134 {offsets = [0, 32], sizes = [2, 32], strides = [1, 1]} : vector<2x128xf32> to vector<2x32xf32>
    %138 = vector.extract_strided_slice %135 {offsets = [0, 64], sizes = [2, 32], strides = [1, 1]} : vector<2x128xf32> to vector<2x32xf32>
    %139 = vector.extract_strided_slice %134 {offsets = [0, 96], sizes = [2, 32], strides = [1, 1]} : vector<2x128xf32> to vector<2x32xf32>
    %140 = arith.mulf %137, %98 : vector<2x32xf32>
    %141 = arith.mulf %136, %138 : vector<2x32xf32>
    %142 = arith.addf %140, %141 : vector<2x32xf32>
    %143 = math.tanh %142 : vector<2x32xf32>
    %144 = arith.mulf %139, %143 : vector<2x32xf32>
    %c6 = arith.constant 6 : index
    %145 = memref.load %arg0[%c6] : memref<16xi32, #tpu.memory_space<smem>>
    %146 = arith.index_cast %145 : i32 to index
    %c0_42 = arith.constant 0 : index
    %147 = vector.load %arg3[%146, %c0_42] : memref<32x128xf32, #tpu.memory_space<vmem>>, vector<1x128xf32>
    %c7 = arith.constant 7 : index
    %148 = memref.load %arg0[%c7] : memref<16xi32, #tpu.memory_space<smem>>
    %149 = arith.index_cast %148 : i32 to index
    %c0_43 = arith.constant 0 : index
    %150 = vector.load %arg3[%149, %c0_43] : memref<32x128xf32, #tpu.memory_space<vmem>>, vector<1x128xf32>
    %151 = tpu.concatenate %147, %150 in 0 : vector<1x128xf32>, vector<1x128xf32> -> vector<2x128xf32>
    %cst_44 = arith.constant dense<0.000000e+00> : vector<2x128xf32>
    %152 = tpu.matmul %124, %0, %cst_44 {dimension_numbers = #tpu.dot_dimension_numbers<[1], [0], [0], [1], [0, 0, 1, 1], [], []>} : vector<2x32xf32>, vector<32x128xf32>, vector<2x128xf32> -> vector<2x128xf32>
    %153 = arith.addf %151, %152 : vector<2x128xf32>
    %154 = arith.negf %153 : vector<2x128xf32>
    %155 = math.exp %154 : vector<2x128xf32>
    %cst_45 = arith.constant 1.000000e+00 : f32
    %156 = vector.broadcast %cst_45 : f32 to vector<2x128xf32>
    %157 = arith.addf %156, %155 : vector<2x128xf32>
    %158 = arith.divf %156, %157 : vector<2x128xf32>
    %159 = math.tanh %153 : vector<2x128xf32>
    %160 = vector.extract_strided_slice %158 {offsets = [0, 0], sizes = [2, 32], strides = [1, 1]} : vector<2x128xf32> to vector<2x32xf32>
    %161 = vector.extract_strided_slice %158 {offsets = [0, 32], sizes = [2, 32], strides = [1, 1]} : vector<2x128xf32> to vector<2x32xf32>
    %162 = vector.extract_strided_slice %159 {offsets = [0, 64], sizes = [2, 32], strides = [1, 1]} : vector<2x128xf32> to vector<2x32xf32>
    %163 = vector.extract_strided_slice %158 {offsets = [0, 96], sizes = [2, 32], strides = [1, 1]} : vector<2x128xf32> to vector<2x32xf32>
    %164 = arith.mulf %161, %122 : vector<2x32xf32>
    %165 = arith.mulf %160, %162 : vector<2x32xf32>
    %166 = arith.addf %164, %165 : vector<2x32xf32>
    %167 = math.tanh %166 : vector<2x32xf32>
    %168 = arith.mulf %163, %167 : vector<2x32xf32>
    %cst_46 = arith.constant dense<0.000000e+00> : vector<2x128xf32>
    %169 = tpu.matmul %168, %1, %cst_46 {dimension_numbers = #tpu.dot_dimension_numbers<[1], [0], [0], [1], [0, 0, 1, 1], [], []>} : vector<2x32xf32>, vector<32x128xf32>, vector<2x128xf32> -> vector<2x128xf32>
    %cst_47 = arith.constant dense<0.000000e+00> : vector<2x128xf32>
    %170 = tpu.matmul %144, %2, %cst_47 {dimension_numbers = #tpu.dot_dimension_numbers<[1], [0], [0], [1], [0, 0, 1, 1], [], []>} : vector<2x32xf32>, vector<32x128xf32>, vector<2x128xf32> -> vector<2x128xf32>
    %171 = arith.addf %169, %170 : vector<2x128xf32>
    %172 = vector.broadcast %3 : vector<1x128xf32> to vector<2x128xf32>
    %173 = arith.addf %171, %172 : vector<2x128xf32>
    %174 = arith.negf %173 : vector<2x128xf32>
    %175 = math.exp %174 : vector<2x128xf32>
    %cst_48 = arith.constant 1.000000e+00 : f32
    %176 = vector.broadcast %cst_48 : f32 to vector<2x128xf32>
    %177 = arith.addf %176, %175 : vector<2x128xf32>
    %178 = arith.divf %176, %177 : vector<2x128xf32>
    %179 = math.tanh %173 : vector<2x128xf32>
    %180 = vector.extract_strided_slice %178 {offsets = [0, 0], sizes = [2, 32], strides = [1, 1]} : vector<2x128xf32> to vector<2x32xf32>
    %181 = vector.extract_strided_slice %178 {offsets = [0, 32], sizes = [2, 32], strides = [1, 1]} : vector<2x128xf32> to vector<2x32xf32>
    %182 = vector.extract_strided_slice %179 {offsets = [0, 64], sizes = [2, 32], strides = [1, 1]} : vector<2x128xf32> to vector<2x32xf32>
    %183 = vector.extract_strided_slice %178 {offsets = [0, 96], sizes = [2, 32], strides = [1, 1]} : vector<2x128xf32> to vector<2x32xf32>
    %184 = arith.mulf %181, %142 : vector<2x32xf32>
    %185 = arith.mulf %180, %182 : vector<2x32xf32>
    %186 = arith.addf %184, %185 : vector<2x32xf32>
    %187 = math.tanh %186 : vector<2x32xf32>
    %188 = arith.mulf %183, %187 : vector<2x32xf32>
    %c8 = arith.constant 8 : index
    %189 = memref.load %arg0[%c8] : memref<16xi32, #tpu.memory_space<smem>>
    %190 = arith.index_cast %189 : i32 to index
    %c0_49 = arith.constant 0 : index
    %191 = vector.load %arg3[%190, %c0_49] : memref<32x128xf32, #tpu.memory_space<vmem>>, vector<1x128xf32>
    %c9 = arith.constant 9 : index
    %192 = memref.load %arg0[%c9] : memref<16xi32, #tpu.memory_space<smem>>
    %193 = arith.index_cast %192 : i32 to index
    %c0_50 = arith.constant 0 : index
    %194 = vector.load %arg3[%193, %c0_50] : memref<32x128xf32, #tpu.memory_space<vmem>>, vector<1x128xf32>
    %195 = tpu.concatenate %191, %194 in 0 : vector<1x128xf32>, vector<1x128xf32> -> vector<2x128xf32>
    %cst_51 = arith.constant dense<0.000000e+00> : vector<2x128xf32>
    %196 = tpu.matmul %168, %0, %cst_51 {dimension_numbers = #tpu.dot_dimension_numbers<[1], [0], [0], [1], [0, 0, 1, 1], [], []>} : vector<2x32xf32>, vector<32x128xf32>, vector<2x128xf32> -> vector<2x128xf32>
    %197 = arith.addf %195, %196 : vector<2x128xf32>
    %198 = arith.negf %197 : vector<2x128xf32>
    %199 = math.exp %198 : vector<2x128xf32>
    %cst_52 = arith.constant 1.000000e+00 : f32
    %200 = vector.broadcast %cst_52 : f32 to vector<2x128xf32>
    %201 = arith.addf %200, %199 : vector<2x128xf32>
    %202 = arith.divf %200, %201 : vector<2x128xf32>
    %203 = math.tanh %197 : vector<2x128xf32>
    %204 = vector.extract_strided_slice %202 {offsets = [0, 0], sizes = [2, 32], strides = [1, 1]} : vector<2x128xf32> to vector<2x32xf32>
    %205 = vector.extract_strided_slice %202 {offsets = [0, 32], sizes = [2, 32], strides = [1, 1]} : vector<2x128xf32> to vector<2x32xf32>
    %206 = vector.extract_strided_slice %203 {offsets = [0, 64], sizes = [2, 32], strides = [1, 1]} : vector<2x128xf32> to vector<2x32xf32>
    %207 = vector.extract_strided_slice %202 {offsets = [0, 96], sizes = [2, 32], strides = [1, 1]} : vector<2x128xf32> to vector<2x32xf32>
    %208 = arith.mulf %205, %166 : vector<2x32xf32>
    %209 = arith.mulf %204, %206 : vector<2x32xf32>
    %210 = arith.addf %208, %209 : vector<2x32xf32>
    %211 = math.tanh %210 : vector<2x32xf32>
    %212 = arith.mulf %207, %211 : vector<2x32xf32>
    %cst_53 = arith.constant dense<0.000000e+00> : vector<2x128xf32>
    %213 = tpu.matmul %212, %1, %cst_53 {dimension_numbers = #tpu.dot_dimension_numbers<[1], [0], [0], [1], [0, 0, 1, 1], [], []>} : vector<2x32xf32>, vector<32x128xf32>, vector<2x128xf32> -> vector<2x128xf32>
    %cst_54 = arith.constant dense<0.000000e+00> : vector<2x128xf32>
    %214 = tpu.matmul %188, %2, %cst_54 {dimension_numbers = #tpu.dot_dimension_numbers<[1], [0], [0], [1], [0, 0, 1, 1], [], []>} : vector<2x32xf32>, vector<32x128xf32>, vector<2x128xf32> -> vector<2x128xf32>
    %215 = arith.addf %213, %214 : vector<2x128xf32>
    %216 = vector.broadcast %3 : vector<1x128xf32> to vector<2x128xf32>
    %217 = arith.addf %215, %216 : vector<2x128xf32>
    %218 = arith.negf %217 : vector<2x128xf32>
    %219 = math.exp %218 : vector<2x128xf32>
    %cst_55 = arith.constant 1.000000e+00 : f32
    %220 = vector.broadcast %cst_55 : f32 to vector<2x128xf32>
    %221 = arith.addf %220, %219 : vector<2x128xf32>
    %222 = arith.divf %220, %221 : vector<2x128xf32>
    %223 = math.tanh %217 : vector<2x128xf32>
    %224 = vector.extract_strided_slice %222 {offsets = [0, 0], sizes = [2, 32], strides = [1, 1]} : vector<2x128xf32> to vector<2x32xf32>
    %225 = vector.extract_strided_slice %222 {offsets = [0, 32], sizes = [2, 32], strides = [1, 1]} : vector<2x128xf32> to vector<2x32xf32>
    %226 = vector.extract_strided_slice %223 {offsets = [0, 64], sizes = [2, 32], strides = [1, 1]} : vector<2x128xf32> to vector<2x32xf32>
    %227 = vector.extract_strided_slice %222 {offsets = [0, 96], sizes = [2, 32], strides = [1, 1]} : vector<2x128xf32> to vector<2x32xf32>
    %228 = arith.mulf %225, %186 : vector<2x32xf32>
    %229 = arith.mulf %224, %226 : vector<2x32xf32>
    %230 = arith.addf %228, %229 : vector<2x32xf32>
    %231 = math.tanh %230 : vector<2x32xf32>
    %232 = arith.mulf %227, %231 : vector<2x32xf32>
    %c10 = arith.constant 10 : index
    %233 = memref.load %arg0[%c10] : memref<16xi32, #tpu.memory_space<smem>>
    %234 = arith.index_cast %233 : i32 to index
    %c0_56 = arith.constant 0 : index
    %235 = vector.load %arg3[%234, %c0_56] : memref<32x128xf32, #tpu.memory_space<vmem>>, vector<1x128xf32>
    %c11 = arith.constant 11 : index
    %236 = memref.load %arg0[%c11] : memref<16xi32, #tpu.memory_space<smem>>
    %237 = arith.index_cast %236 : i32 to index
    %c0_57 = arith.constant 0 : index
    %238 = vector.load %arg3[%237, %c0_57] : memref<32x128xf32, #tpu.memory_space<vmem>>, vector<1x128xf32>
    %239 = tpu.concatenate %235, %238 in 0 : vector<1x128xf32>, vector<1x128xf32> -> vector<2x128xf32>
    %cst_58 = arith.constant dense<0.000000e+00> : vector<2x128xf32>
    %240 = tpu.matmul %212, %0, %cst_58 {dimension_numbers = #tpu.dot_dimension_numbers<[1], [0], [0], [1], [0, 0, 1, 1], [], []>} : vector<2x32xf32>, vector<32x128xf32>, vector<2x128xf32> -> vector<2x128xf32>
    %241 = arith.addf %239, %240 : vector<2x128xf32>
    %242 = arith.negf %241 : vector<2x128xf32>
    %243 = math.exp %242 : vector<2x128xf32>
    %cst_59 = arith.constant 1.000000e+00 : f32
    %244 = vector.broadcast %cst_59 : f32 to vector<2x128xf32>
    %245 = arith.addf %244, %243 : vector<2x128xf32>
    %246 = arith.divf %244, %245 : vector<2x128xf32>
    %247 = math.tanh %241 : vector<2x128xf32>
    %248 = vector.extract_strided_slice %246 {offsets = [0, 0], sizes = [2, 32], strides = [1, 1]} : vector<2x128xf32> to vector<2x32xf32>
    %249 = vector.extract_strided_slice %246 {offsets = [0, 32], sizes = [2, 32], strides = [1, 1]} : vector<2x128xf32> to vector<2x32xf32>
    %250 = vector.extract_strided_slice %247 {offsets = [0, 64], sizes = [2, 32], strides = [1, 1]} : vector<2x128xf32> to vector<2x32xf32>
    %251 = vector.extract_strided_slice %246 {offsets = [0, 96], sizes = [2, 32], strides = [1, 1]} : vector<2x128xf32> to vector<2x32xf32>
    %252 = arith.mulf %249, %210 : vector<2x32xf32>
    %253 = arith.mulf %248, %250 : vector<2x32xf32>
    %254 = arith.addf %252, %253 : vector<2x32xf32>
    %255 = math.tanh %254 : vector<2x32xf32>
    %256 = arith.mulf %251, %255 : vector<2x32xf32>
    %cst_60 = arith.constant dense<0.000000e+00> : vector<2x128xf32>
    %257 = tpu.matmul %256, %1, %cst_60 {dimension_numbers = #tpu.dot_dimension_numbers<[1], [0], [0], [1], [0, 0, 1, 1], [], []>} : vector<2x32xf32>, vector<32x128xf32>, vector<2x128xf32> -> vector<2x128xf32>
    %cst_61 = arith.constant dense<0.000000e+00> : vector<2x128xf32>
    %258 = tpu.matmul %232, %2, %cst_61 {dimension_numbers = #tpu.dot_dimension_numbers<[1], [0], [0], [1], [0, 0, 1, 1], [], []>} : vector<2x32xf32>, vector<32x128xf32>, vector<2x128xf32> -> vector<2x128xf32>
    %259 = arith.addf %257, %258 : vector<2x128xf32>
    %260 = vector.broadcast %3 : vector<1x128xf32> to vector<2x128xf32>
    %261 = arith.addf %259, %260 : vector<2x128xf32>
    %262 = arith.negf %261 : vector<2x128xf32>
    %263 = math.exp %262 : vector<2x128xf32>
    %cst_62 = arith.constant 1.000000e+00 : f32
    %264 = vector.broadcast %cst_62 : f32 to vector<2x128xf32>
    %265 = arith.addf %264, %263 : vector<2x128xf32>
    %266 = arith.divf %264, %265 : vector<2x128xf32>
    %267 = math.tanh %261 : vector<2x128xf32>
    %268 = vector.extract_strided_slice %266 {offsets = [0, 0], sizes = [2, 32], strides = [1, 1]} : vector<2x128xf32> to vector<2x32xf32>
    %269 = vector.extract_strided_slice %266 {offsets = [0, 32], sizes = [2, 32], strides = [1, 1]} : vector<2x128xf32> to vector<2x32xf32>
    %270 = vector.extract_strided_slice %267 {offsets = [0, 64], sizes = [2, 32], strides = [1, 1]} : vector<2x128xf32> to vector<2x32xf32>
    %271 = vector.extract_strided_slice %266 {offsets = [0, 96], sizes = [2, 32], strides = [1, 1]} : vector<2x128xf32> to vector<2x32xf32>
    %272 = arith.mulf %269, %230 : vector<2x32xf32>
    %273 = arith.mulf %268, %270 : vector<2x32xf32>
    %274 = arith.addf %272, %273 : vector<2x32xf32>
    %275 = math.tanh %274 : vector<2x32xf32>
    %276 = arith.mulf %271, %275 : vector<2x32xf32>
    %c12 = arith.constant 12 : index
    %277 = memref.load %arg0[%c12] : memref<16xi32, #tpu.memory_space<smem>>
    %278 = arith.index_cast %277 : i32 to index
    %c0_63 = arith.constant 0 : index
    %279 = vector.load %arg3[%278, %c0_63] : memref<32x128xf32, #tpu.memory_space<vmem>>, vector<1x128xf32>
    %c13 = arith.constant 13 : index
    %280 = memref.load %arg0[%c13] : memref<16xi32, #tpu.memory_space<smem>>
    %281 = arith.index_cast %280 : i32 to index
    %c0_64 = arith.constant 0 : index
    %282 = vector.load %arg3[%281, %c0_64] : memref<32x128xf32, #tpu.memory_space<vmem>>, vector<1x128xf32>
    %283 = tpu.concatenate %279, %282 in 0 : vector<1x128xf32>, vector<1x128xf32> -> vector<2x128xf32>
    %cst_65 = arith.constant dense<0.000000e+00> : vector<2x128xf32>
    %284 = tpu.matmul %256, %0, %cst_65 {dimension_numbers = #tpu.dot_dimension_numbers<[1], [0], [0], [1], [0, 0, 1, 1], [], []>} : vector<2x32xf32>, vector<32x128xf32>, vector<2x128xf32> -> vector<2x128xf32>
    %285 = arith.addf %283, %284 : vector<2x128xf32>
    %286 = arith.negf %285 : vector<2x128xf32>
    %287 = math.exp %286 : vector<2x128xf32>
    %cst_66 = arith.constant 1.000000e+00 : f32
    %288 = vector.broadcast %cst_66 : f32 to vector<2x128xf32>
    %289 = arith.addf %288, %287 : vector<2x128xf32>
    %290 = arith.divf %288, %289 : vector<2x128xf32>
    %291 = math.tanh %285 : vector<2x128xf32>
    %292 = vector.extract_strided_slice %290 {offsets = [0, 0], sizes = [2, 32], strides = [1, 1]} : vector<2x128xf32> to vector<2x32xf32>
    %293 = vector.extract_strided_slice %290 {offsets = [0, 32], sizes = [2, 32], strides = [1, 1]} : vector<2x128xf32> to vector<2x32xf32>
    %294 = vector.extract_strided_slice %291 {offsets = [0, 64], sizes = [2, 32], strides = [1, 1]} : vector<2x128xf32> to vector<2x32xf32>
    %295 = vector.extract_strided_slice %290 {offsets = [0, 96], sizes = [2, 32], strides = [1, 1]} : vector<2x128xf32> to vector<2x32xf32>
    %296 = arith.mulf %293, %254 : vector<2x32xf32>
    %297 = arith.mulf %292, %294 : vector<2x32xf32>
    %298 = arith.addf %296, %297 : vector<2x32xf32>
    %299 = math.tanh %298 : vector<2x32xf32>
    %300 = arith.mulf %295, %299 : vector<2x32xf32>
    %cst_67 = arith.constant dense<0.000000e+00> : vector<2x128xf32>
    %301 = tpu.matmul %300, %1, %cst_67 {dimension_numbers = #tpu.dot_dimension_numbers<[1], [0], [0], [1], [0, 0, 1, 1], [], []>} : vector<2x32xf32>, vector<32x128xf32>, vector<2x128xf32> -> vector<2x128xf32>
    %cst_68 = arith.constant dense<0.000000e+00> : vector<2x128xf32>
    %302 = tpu.matmul %276, %2, %cst_68 {dimension_numbers = #tpu.dot_dimension_numbers<[1], [0], [0], [1], [0, 0, 1, 1], [], []>} : vector<2x32xf32>, vector<32x128xf32>, vector<2x128xf32> -> vector<2x128xf32>
    %303 = arith.addf %301, %302 : vector<2x128xf32>
    %304 = vector.broadcast %3 : vector<1x128xf32> to vector<2x128xf32>
    %305 = arith.addf %303, %304 : vector<2x128xf32>
    %306 = arith.negf %305 : vector<2x128xf32>
    %307 = math.exp %306 : vector<2x128xf32>
    %cst_69 = arith.constant 1.000000e+00 : f32
    %308 = vector.broadcast %cst_69 : f32 to vector<2x128xf32>
    %309 = arith.addf %308, %307 : vector<2x128xf32>
    %310 = arith.divf %308, %309 : vector<2x128xf32>
    %311 = math.tanh %305 : vector<2x128xf32>
    %312 = vector.extract_strided_slice %310 {offsets = [0, 0], sizes = [2, 32], strides = [1, 1]} : vector<2x128xf32> to vector<2x32xf32>
    %313 = vector.extract_strided_slice %310 {offsets = [0, 32], sizes = [2, 32], strides = [1, 1]} : vector<2x128xf32> to vector<2x32xf32>
    %314 = vector.extract_strided_slice %311 {offsets = [0, 64], sizes = [2, 32], strides = [1, 1]} : vector<2x128xf32> to vector<2x32xf32>
    %315 = vector.extract_strided_slice %310 {offsets = [0, 96], sizes = [2, 32], strides = [1, 1]} : vector<2x128xf32> to vector<2x32xf32>
    %316 = arith.mulf %313, %274 : vector<2x32xf32>
    %317 = arith.mulf %312, %314 : vector<2x32xf32>
    %318 = arith.addf %316, %317 : vector<2x32xf32>
    %319 = math.tanh %318 : vector<2x32xf32>
    %320 = arith.mulf %315, %319 : vector<2x32xf32>
    %c0_70 = arith.constant 0 : index
    %c0_71 = arith.constant 0 : index
    %321 = vector.load %arg8[%c0_70, %c0_71] : memref<32x32xf32, #tpu.memory_space<vmem>>, vector<32x32xf32>
    %cst_72 = arith.constant dense<0.000000e+00> : vector<2x32xf32>
    %322 = tpu.matmul %320, %321, %cst_72 {dimension_numbers = #tpu.dot_dimension_numbers<[1], [0], [0], [1], [0, 0, 1, 1], [], []>} : vector<2x32xf32>, vector<32x32xf32>, vector<2x32xf32> -> vector<2x32xf32>
    %323 = vector.broadcast %12 : vector<1x32xf32> to vector<2x32xf32>
    %324 = arith.addf %323, %322 : vector<2x32xf32>
    %c14 = arith.constant 14 : index
    %325 = memref.load %arg0[%c14] : memref<16xi32, #tpu.memory_space<smem>>
    %326 = arith.index_cast %325 : i32 to index
    %c0_73 = arith.constant 0 : index
    %327 = vector.load %arg3[%326, %c0_73] : memref<32x128xf32, #tpu.memory_space<vmem>>, vector<1x128xf32>
    %c15 = arith.constant 15 : index
    %328 = memref.load %arg0[%c15] : memref<16xi32, #tpu.memory_space<smem>>
    %329 = arith.index_cast %328 : i32 to index
    %c0_74 = arith.constant 0 : index
    %330 = vector.load %arg3[%329, %c0_74] : memref<32x128xf32, #tpu.memory_space<vmem>>, vector<1x128xf32>
    %331 = tpu.concatenate %327, %330 in 0 : vector<1x128xf32>, vector<1x128xf32> -> vector<2x128xf32>
    %cst_75 = arith.constant dense<0.000000e+00> : vector<2x128xf32>
    %332 = tpu.matmul %300, %0, %cst_75 {dimension_numbers = #tpu.dot_dimension_numbers<[1], [0], [0], [1], [0, 0, 1, 1], [], []>} : vector<2x32xf32>, vector<32x128xf32>, vector<2x128xf32> -> vector<2x128xf32>
    %333 = arith.addf %331, %332 : vector<2x128xf32>
    %334 = arith.negf %333 : vector<2x128xf32>
    %335 = math.exp %334 : vector<2x128xf32>
    %cst_76 = arith.constant 1.000000e+00 : f32
    %336 = vector.broadcast %cst_76 : f32 to vector<2x128xf32>
    %337 = arith.addf %336, %335 : vector<2x128xf32>
    %338 = arith.divf %336, %337 : vector<2x128xf32>
    %339 = math.tanh %333 : vector<2x128xf32>
    %340 = vector.extract_strided_slice %338 {offsets = [0, 0], sizes = [2, 32], strides = [1, 1]} : vector<2x128xf32> to vector<2x32xf32>
    %341 = vector.extract_strided_slice %338 {offsets = [0, 32], sizes = [2, 32], strides = [1, 1]} : vector<2x128xf32> to vector<2x32xf32>
    %342 = vector.extract_strided_slice %339 {offsets = [0, 64], sizes = [2, 32], strides = [1, 1]} : vector<2x128xf32> to vector<2x32xf32>
    %343 = vector.extract_strided_slice %338 {offsets = [0, 96], sizes = [2, 32], strides = [1, 1]} : vector<2x128xf32> to vector<2x32xf32>
    %344 = arith.mulf %341, %298 : vector<2x32xf32>
    %345 = arith.mulf %340, %342 : vector<2x32xf32>
    %346 = arith.addf %344, %345 : vector<2x32xf32>
    %347 = math.tanh %346 : vector<2x32xf32>
    %348 = arith.mulf %343, %347 : vector<2x32xf32>
    %cst_77 = arith.constant dense<0.000000e+00> : vector<2x128xf32>
    %349 = tpu.matmul %348, %1, %cst_77 {dimension_numbers = #tpu.dot_dimension_numbers<[1], [0], [0], [1], [0, 0, 1, 1], [], []>} : vector<2x32xf32>, vector<32x128xf32>, vector<2x128xf32> -> vector<2x128xf32>
    %cst_78 = arith.constant dense<0.000000e+00> : vector<2x128xf32>
    %350 = tpu.matmul %320, %2, %cst_78 {dimension_numbers = #tpu.dot_dimension_numbers<[1], [0], [0], [1], [0, 0, 1, 1], [], []>} : vector<2x32xf32>, vector<32x128xf32>, vector<2x128xf32> -> vector<2x128xf32>
    %351 = arith.addf %349, %350 : vector<2x128xf32>
    %352 = vector.broadcast %3 : vector<1x128xf32> to vector<2x128xf32>
    %353 = arith.addf %351, %352 : vector<2x128xf32>
    %354 = arith.negf %353 : vector<2x128xf32>
    %355 = math.exp %354 : vector<2x128xf32>
    %cst_79 = arith.constant 1.000000e+00 : f32
    %356 = vector.broadcast %cst_79 : f32 to vector<2x128xf32>
    %357 = arith.addf %356, %355 : vector<2x128xf32>
    %358 = arith.divf %356, %357 : vector<2x128xf32>
    %359 = math.tanh %353 : vector<2x128xf32>
    %360 = vector.extract_strided_slice %358 {offsets = [0, 0], sizes = [2, 32], strides = [1, 1]} : vector<2x128xf32> to vector<2x32xf32>
    %361 = vector.extract_strided_slice %358 {offsets = [0, 32], sizes = [2, 32], strides = [1, 1]} : vector<2x128xf32> to vector<2x32xf32>
    %362 = vector.extract_strided_slice %359 {offsets = [0, 64], sizes = [2, 32], strides = [1, 1]} : vector<2x128xf32> to vector<2x32xf32>
    %363 = vector.extract_strided_slice %358 {offsets = [0, 96], sizes = [2, 32], strides = [1, 1]} : vector<2x128xf32> to vector<2x32xf32>
    %364 = arith.mulf %361, %318 : vector<2x32xf32>
    %365 = arith.mulf %360, %362 : vector<2x32xf32>
    %366 = arith.addf %364, %365 : vector<2x32xf32>
    %367 = math.tanh %366 : vector<2x32xf32>
    %368 = arith.mulf %363, %367 : vector<2x32xf32>
    %c0_80 = arith.constant 0 : index
    %c0_81 = arith.constant 0 : index
    %369 = vector.load %arg9[%c0_80, %c0_81] : memref<32x32xf32, #tpu.memory_space<vmem>>, vector<32x32xf32>
    %cst_82 = arith.constant dense<0.000000e+00> : vector<2x32xf32>
    %370 = tpu.matmul %368, %369, %cst_82 {dimension_numbers = #tpu.dot_dimension_numbers<[1], [0], [0], [1], [0, 0, 1, 1], [], []>} : vector<2x32xf32>, vector<32x32xf32>, vector<2x32xf32> -> vector<2x32xf32>
    %371 = arith.addf %324, %370 : vector<2x32xf32>
    %c0_83 = arith.constant 0 : index
    %c0_84 = arith.constant 0 : index
    %c0_85 = arith.constant 0 : index
    %372 = vector.load %arg12[%c0_83, %c0_84, %c0_85] : memref<2x2x32xf32, #tpu.memory_space<vmem>>, vector<1x2x32xf32>
    %373 = vector.shape_cast %372 : vector<1x2x32xf32> to vector<2x32xf32>
    %374 = vector.shape_cast %348 : vector<2x32xf32> to vector<1x2x32xf32>
    tpu.vector_store %arg12[%c0_83, %c0_84, %c0_85], %374 {strides = array<i32>} : memref<2x2x32xf32, #tpu.memory_space<vmem>>, vector<1x2x32xf32>,
    %c0_86 = arith.constant 0 : index
    %c0_87 = arith.constant 0 : index
    %c0_88 = arith.constant 0 : index
    %375 = vector.load %arg13[%c0_86, %c0_87, %c0_88] : memref<2x2x32xf32, #tpu.memory_space<vmem>>, vector<1x2x32xf32>
    %376 = vector.shape_cast %375 : vector<1x2x32xf32> to vector<2x32xf32>
    %377 = vector.shape_cast %346 : vector<2x32xf32> to vector<1x2x32xf32>
    tpu.vector_store %arg13[%c0_86, %c0_87, %c0_88], %377 {strides = array<i32>} : memref<2x2x32xf32, #tpu.memory_space<vmem>>, vector<1x2x32xf32>,
    %c1_89 = arith.constant 1 : index
    %c0_90 = arith.constant 0 : index
    %c0_91 = arith.constant 0 : index
    %378 = vector.load %arg12[%c1_89, %c0_90, %c0_91] : memref<2x2x32xf32, #tpu.memory_space<vmem>>, vector<1x2x32xf32>
    %379 = vector.shape_cast %378 : vector<1x2x32xf32> to vector<2x32xf32>
    %380 = vector.shape_cast %368 : vector<2x32xf32> to vector<1x2x32xf32>
    tpu.vector_store %arg12[%c1_89, %c0_90, %c0_91], %380 {strides = array<i32>} : memref<2x2x32xf32, #tpu.memory_space<vmem>>, vector<1x2x32xf32>,
    %c1_92 = arith.constant 1 : index
    %c0_93 = arith.constant 0 : index
    %c0_94 = arith.constant 0 : index
    %381 = vector.load %arg13[%c1_92, %c0_93, %c0_94] : memref<2x2x32xf32, #tpu.memory_space<vmem>>, vector<1x2x32xf32>
    %382 = vector.shape_cast %381 : vector<1x2x32xf32> to vector<2x32xf32>
    %383 = vector.shape_cast %366 : vector<2x32xf32> to vector<1x2x32xf32>
    tpu.vector_store %arg13[%c1_92, %c0_93, %c0_94], %383 {strides = array<i32>} : memref<2x2x32xf32, #tpu.memory_space<vmem>>, vector<1x2x32xf32>,
    %c0_95 = arith.constant 0 : index
    %c0_96 = arith.constant 0 : index
    %384 = vector.load %arg11[%c0_95, %c0_96] : memref<2x32xf32, #tpu.memory_space<vmem>>, vector<2x32xf32>
    tpu.vector_store %arg11[%c0_95, %c0_96], %371 {strides = array<i32>} : memref<2x32xf32, #tpu.memory_space<vmem>>, vector<2x32xf32>,
    return
  }
}

</mosaic_0001>

<bundles_post_ra>
// kernel: machine_sponge_forward.1
= control target key start
LH: loop header
LB: loop body
LE: loop exit
PB: predicated region body
PF: predicated region fallthrough
CT: control target
= control target key end

     0   :  { %19 = vsyncpa [#allocation5], 0  ;;  %s4256_s0 = inlined_call_operand.vmem [shape: s32[16], index: 0, kind: input, shape index: {}]   ;;  %s4257_s1 = inlined_call_operand.vmem [shape: f32[2,2,32], index: 1, kind: input, shape index: {}]   ;;  %s4258_s2 = inlined_call_operand.vmem [shape: f32[2,2,32], index: 2, kind: input, shape index: {}]   ;;  %s4259_s3 = inlined_call_operand.hbm [shape: f32[32,128], index: 3, kind: input, shape index: {}]   ;;  %s4260_s4 = inlined_call_operand.vmem [shape: f32[32,128], index: 4, kind: input, shape index: {}]   ;;  %s4261_s5 = inlined_call_operand.hbm [shape: f32[32,128], index: 5, kind: input, shape index: {}]   ;;  %s4262_s6 = inlined_call_operand.hbm [shape: f32[32,128], index: 6, kind: input, shape index: {}]   ;;  %s4263_s7 = inlined_call_operand.vmem [shape: f32[1,128], index: 7, kind: input, shape index: {}]   ;;  %s4264_s8 = inlined_call_operand.hbm [shape: f32[32,32], index: 8, kind: input, shape index: {}]   ;;  %s4265_s9 = inlined_call_operand.hbm [shape: f32[32,32], index: 9, kind: input, shape index: {}]   ;;  %s4266_s10 = inlined_call_operand.hbm [shape: f32[1,32], index: 10, kind: input, shape index: {}]   ;;  %s4267_s11 = inlined_call_operand.hbm [shape: f32[2,32], index: 11, kind: output, shape index: {0}]   ;;  %s4268_s12 = inlined_call_operand.hbm [shape: f32[2,2,32], index: 12, kind: output, shape index: {1}]   ;;  %s4269_s13 = inlined_call_operand.hbm [shape: f32[2,2,32], index: 13, kind: output, shape index: {2}]  }
   0x1   :  { %20 = vsyncpa [#allocation3], 0 }
   0x2   :  { %21 = vsyncpa [#allocation8], 0 }
   0x3   :  { %22 = vsyncpa [#allocation11], 0 }
   0x4   :  { %23 = vsyncpa [#allocation14], 0 }
   0x5   :  { %24 = vsyncpa [#allocation4], 0 }
   0x6   :  { %25 = vsyncpa [#allocation17], 0  ;;  %s3666_s25 = smov [#allocation7]   ;;  %s3667_s27 = smov [#allocation10]  }
   0x7   :  { %s59_s26 = sshll.u32 %s3666_s25, 4  ;;  %s85_s28 = sshll.u32 %s3667_s27, 4  ;;  %s60_s26 = int_to_ptr.vmem [resolvable:$true] %s59_s26  ;;  %s3755_s28 = int_to_ptr.vmem [resolvable:$true] %s85_s28 }
   0x8   :  { %s3442_s14 = scalar_lea.hbm %s4261_s5, 512 }
   0x9   :  { %p3443_p0 = scmp.ne.s32.totalorder %s4261_s5, %s3442_s14  ;;  %p3446_p1 = scmp.lt.u32.totalorder %s3442_s14, %s4261_s5 }
   0xb   :  { %p3448_p2 = pnand %p3446_p1, %p3443_p0 }
   0xd   :  { %3451 = shalt.err (!%p3448_p2)
}
   0xe   :  { %s3452_s19 = scalar_lea.vmem %s60_s26, 512  ;;  %p3457_p4 = scmp.lt.s32.totalorder %s60_s26, %s60_s26 }
   0xf   :  { %p3453_p3 = scmp.ne.s32.totalorder %s60_s26, %s3452_s19  ;;  %p3458_p5 = scmp.lt.s32.totalorder %s3452_s19, %s3452_s19 }
  0x11   :  { %p3459_p6 = por %p3458_p5, %p3457_p4 }
  0x13   :  { %p3460_p7 = pnand %p3459_p6, %p3453_p3 }
  0x15   :  { %3463 = shalt.err (!%p3460_p7)
}
  0x16   :  { %s3668_s20 = smov 128   ;;  %s3669_s21 = smov 8  }
  0x17   :  { %65 = dma.hbm_to_vmem [thread:$0]  %s4261_s5, 512, %s60_s26, [#allocation8], %s3668_s20, %s3668_s20, %s3669_s21  }
  0x18   :  { %s3464_s27 = scalar_lea.hbm %s4264_s8, 512 }
  0x19   :  { %p3465_p8 = scmp.ne.s32.totalorder %s4264_s8, %s3464_s27  ;;  %p3468_p9 = scmp.lt.u32.totalorder %s3464_s27, %s4264_s8 }
  0x1b   :  { %p3470_p10 = pnand %p3468_p9, %p3465_p8 }
  0x1d   :  { %3473 = shalt.err (!%p3470_p10)
}
  0x1e   :  { %s3474_s16 = scalar_lea.vmem %s3755_s28, 512  ;;  %p3479_p12 = scmp.lt.s32.totalorder %s3755_s28, %s3755_s28 }
  0x1f   :  { %p3475_p11 = scmp.ne.s32.totalorder %s3755_s28, %s3474_s16  ;;  %p3480_p13 = scmp.lt.s32.totalorder %s3474_s16, %s3474_s16 }
  0x21   :  { %p3481_p0 = por %p3480_p13, %p3479_p12 }
  0x23   :  { %p3482_p1 = pnand %p3481_p0, %p3475_p11 }
  0x25   :  { %3485 = shalt.err (!%p3482_p1)
}
  0x26   :  { %91 = dma.hbm_to_vmem [thread:$0]  %s4264_s8, 512, %s3755_s28, [#allocation11], %s3668_s20, %s3668_s20, %s3669_s21  }
  0x27   :  { %s32_s19 = sshll.u32 %s4256_s0, 4  ;;  %s33_s19 = int_to_ptr.vmem [resolvable:$true] %s32_s19 }
  0x28   :  { %s3486_s22 = scalar_lea.vmem %s33_s19, 16  ;;  %p3491_p3 = scmp.lt.s32.totalorder %s33_s19, %s33_s19 }
  0x29   :  { %p3487_p2 = scmp.ne.s32.totalorder %s33_s19, %s3486_s22  ;;  %p3492_p4 = scmp.lt.s32.totalorder %s3486_s22, %s3486_s22 }
  0x2b   :  { %p3493_p5 = por %p3492_p4, %p3491_p3 }
  0x2d   :  { %p3494_p6 = pnand %p3493_p5, %p3487_p2 }
  0x2f   :  { %3497 = shalt.err (!%p3494_p6)
}
  0x30   :  { %s3670_s23 = smov [#allocation2]   ;;  %s3671_s24 = smov [#allocation6]  }
  0x31   :  { %35 = dma.vmem_to_smem %s33_s19, 16, %s3670_s23, [#allocation5]  }
  0x32   :  { %s45_s25 = sshll.u32 %s3671_s24, 4  ;;  %s3672_s27 = smov [#allocation9]   ;;  %s46_s25 = int_to_ptr.vmem [resolvable:$true] %s45_s25 }
  0x33   :  { %s71_s29 = sshll.u32 %s3672_s27, 4  ;;  %s3498_s30 = scalar_lea.hbm %s4259_s3, 512  ;;  %s72_s29 = int_to_ptr.vmem [resolvable:$true] %s71_s29 }
  0x34   :  { %p3499_p7 = scmp.ne.s32.totalorder %s4259_s3, %s3498_s30  ;;  %p3502_p8 = scmp.lt.u32.totalorder %s3498_s30, %s4259_s3 }
  0x36   :  { %p3504_p9 = pnand %p3502_p8, %p3499_p7 }
  0x38   :  { %3507 = shalt.err (!%p3504_p9)
}
  0x39   :  { %s3508_s5 = scalar_lea.vmem %s46_s25, 512  ;;  %p3513_p11 = scmp.lt.s32.totalorder %s46_s25, %s46_s25 }
  0x3a   :  { %p3509_p10 = scmp.ne.s32.totalorder %s46_s25, %s3508_s5  ;;  %p3514_p12 = scmp.lt.s32.totalorder %s3508_s5, %s3508_s5 }
  0x3c   :  { %p3515_p13 = por %p3514_p12, %p3513_p11 }
  0x3e   :  { %p3516_p0 = pnand %p3515_p13, %p3509_p10 }
  0x40   :  { %3519 = shalt.err (!%p3516_p0)
}
  0x41   :  { %51 = dma.hbm_to_vmem [thread:$0]  %s4259_s3, 512, %s46_s25, [#allocation3], %s3668_s20, %s3668_s20, %s3669_s21  }
  0x42   :  { %s3520_s22 = scalar_lea.hbm %s4262_s6, 512 }
  0x43   :  { %p3521_p1 = scmp.ne.s32.totalorder %s4262_s6, %s3520_s22  ;;  %p3524_p2 = scmp.lt.u32.totalorder %s3520_s22, %s4262_s6 }
  0x45   :  { %p3526_p3 = pnand %p3524_p2, %p3521_p1 }
  0x47   :  { %3529 = shalt.err (!%p3526_p3)
}
  0x48   :  { %s3530_s28 = scalar_lea.vmem %s72_s29, 512  ;;  %p3535_p5 = scmp.lt.s32.totalorder %s72_s29, %s72_s29 }
  0x49   :  { %p3531_p4 = scmp.ne.s32.totalorder %s72_s29, %s3530_s28  ;;  %p3536_p6 = scmp.lt.s32.totalorder %s3530_s28, %s3530_s28 }
  0x4b   :  { %p3537_p7 = por %p3536_p6, %p3535_p5 }
  0x4d   :  { %p3538_p8 = pnand %p3537_p7, %p3531_p4 }
  0x4f   :  { %3541 = shalt.err (!%p3538_p8)
}
  0x50   :  { %77 = dma.hbm_to_vmem [thread:$0]  %s4262_s6, 512, %s72_s29, [#allocation8], %s3668_s20, %s3668_s20, %s3669_s21  }
  0x51   :  { %s3673_s30 = smov [#allocation12]   ;;  %s3674_s14 = smov [#allocation13]  }
  0x52   :  { %s97_s0 = sshll.u32 %s3673_s30, 4  ;;  %s110_s15 = sshll.u32 %s3674_s14, 4  ;;  %s98_s0 = int_to_ptr.vmem [resolvable:$true] %s97_s0  ;;  %s111_s15 = int_to_ptr.vmem [resolvable:$true] %s110_s15 }
  0x53   :  { %s3542_s26 = scalar_lea.hbm %s4265_s9, 512 }
  0x54   :  { %p3543_p9 = scmp.ne.s32.totalorder %s4265_s9, %s3542_s26  ;;  %p3546_p10 = scmp.lt.u32.totalorder %s3542_s26, %s4265_s9 }
  0x56   :  { %p3548_p11 = pnand %p3546_p10, %p3543_p9 }
  0x58   :  { %3551 = shalt.err (!%p3548_p11)
}
  0x59   :  { %s3552_s6 = scalar_lea.vmem %s98_s0, 512  ;;  %p3557_p13 = scmp.lt.s32.totalorder %s98_s0, %s98_s0 }
  0x5a   :  { %p3553_p12 = scmp.ne.s32.totalorder %s98_s0, %s3552_s6  ;;  %p3558_p0 = scmp.lt.s32.totalorder %s3552_s6, %s3552_s6 }
  0x5c   :  { %p3559_p1 = por %p3558_p0, %p3557_p13 }
  0x5e   :  { %p3560_p2 = pnand %p3559_p1, %p3553_p12 }
  0x60   :  { %3563 = shalt.err (!%p3560_p2)
}
  0x61   :  { %103 = dma.hbm_to_vmem [thread:$0]  %s4265_s9, 512, %s98_s0, [#allocation11], %s3668_s20, %s3668_s20, %s3669_s21  }
  0x62   :  { %s3564_s8 = scalar_lea.hbm %s4266_s10, 16 }
  0x63   :  { %p3565_p3 = scmp.ne.s32.totalorder %s4266_s10, %s3564_s8  ;;  %p3568_p4 = scmp.lt.u32.totalorder %s3564_s8, %s4266_s10 }
  0x65   :  { %p3570_p5 = pnand %p3568_p4, %p3565_p3 }
  0x67   :  { %3573 = shalt.err (!%p3570_p5)
}
  0x68   :  { %s3574_s14 = scalar_lea.vmem %s111_s15, 16  ;;  %s3578_s16 = scalar_lea.vmem %s111_s15, 32 }
  0x69   :  { %p3575_p6 = scmp.ne.s32.totalorder %s111_s15, %s3574_s14  ;;  %p3579_p7 = scmp.lt.s32.totalorder %s111_s15, %s111_s15 }
  0x6a   :  { %p3580_p8 = scmp.lt.s32.totalorder %s3578_s16, %s3574_s14 }
  0x6c   :  { %p3581_p9 = por %p3580_p8, %p3579_p7 }
  0x6e   :  { %p3582_p10 = pnand %p3581_p9, %p3575_p6 }
  0x70   :  { %3585 = shalt.err (!%p3582_p10)
}
  0x71   :  { %113 = dma.hbm_to_vmem [thread:$0]  %s4266_s10, 16, %s111_s15, [#allocation14]  }
  0x72   :  { %3652 = dma.done.wait [#allocation5], 16  }
  0x73   :  { %3653 = vsyncadd [#allocation5], 4294967280 }
  0x74   :  { %3654 = dma.done.wait [#allocation3], 512  }
  0x75   :  { %3655 = vsyncadd [#allocation3], 4294966784 }
  0x76   :  { %3656 = dma.done.wait [#allocation8], 1024  }
  0x77   :  { %3657 = vsyncadd [#allocation8], 4294966272 }
  0x78   :  { %3658 = dma.done.wait [#allocation11], 1024  }
  0x79   :  { %3659 = vsyncadd [#allocation11], 4294966272 }
  0x7a   :  { %3660 = dma.done.wait [#allocation14], 16  }
  0x7b   :  { %3661 = vsyncadd [#allocation14], 4294967280 }
  0x7c   :  { %135 = sfence }
  0x7d   :  { %v136_v0 = vld [vmem:[%s4260_s4] sm:$0xff]  ;;  %v137_v1 = vld [vmem:[%s4260_s4 + $0x8] sm:$0xff]  ;;  %v138_v2 = vld [vmem:[%s4260_s4 + $0x10] sm:$0xff]  ;;  %v3675_v3 = vmov 0.0|0.0   ;;  %vm3676_vm0 = vmmov 0   ;;  %v3677_v6 = vmov 0.0  }
  0x7e   :  { %3135 = vmatprep.subr.bf16.mxu0 %v3675_v3  ;;  %v3862_v4 = vpack.c.bf16 %v137_v1, %v136_v0  ;;  %v139_v5 = vld [vmem:[%s4260_s4 + $0x18] sm:$0xff]  ;;  %2857 = vmatprep.mubr.msk.f32.mxu0 %vm3676_vm0, %v3677_v6  ;;  %v149_v8 = vld [vmem:[%s4257_s1] sm:$0x3]  ;;  %vm167_vm1 = vcmask 261120   ;;  %s2660_s22 = sld [smem:[#allocation2 + $0x1]]  ;;  %s156_s6 = sld [smem:[#allocation2]] }
  0x7f   :  { %3141 = vmatprep.subr.bf16.mxu1 %v3675_v3  ;;  %2868 = vmatprep.mubr.msk.f32.mxu1 %vm3676_vm0, %v3677_v6  ;;  %v3873_v7 = vpack.c.bf16 %v139_v5, %v138_v2  ;;  %vm165_vm2 = vcmask 1040384   ;;  %s3678_s24 = smov 64   ;;  %v150_v17 = vld [vmem:[%s4258_s2] sm:$0x3]  ;;  %s3679_s28 = smov 32   ;;  %v145_v29 = vld [vmem:[#allocation9 + $0x8] sm:$0xff] }
  0x80   :  { %3137 = vmatpush3.bf16.msra.mxu0 %v3862_v4  ;;  %v144_v28 = vld [vmem:[#allocation9] sm:$0xff]  ;;  %v146_v30 = vld [vmem:[#allocation9 + $0x10] sm:$0xff]  ;;  %v147_v32 = vld [vmem:[#allocation9 + $0x18] sm:$0xff]  ;;  %s2667_s30 = sld [smem:[#allocation2 + $0x2]]  ;;  %s2674_s5 = sld [smem:[#allocation2 + $0x4]]  ;;  %vm2575_vm3 = vcmask 254976  }
  0x81   :  { %3138 = vmatprep.subr.bf16.mxu0 %v3675_v3  ;;  %v3894_v31 = vpack.c.bf16 %v145_v29, %v144_v28  ;;  %v140_v33 = vld [vmem:[#allocation7] sm:$0xff]  ;;  %v141_v34 = vld [vmem:[#allocation7 + $0x8] sm:$0xff]  ;;  %v142_v35 = vld [vmem:[#allocation7 + $0x10] sm:$0xff]  ;;  %v3897_v37 = vpack.c.bf16 %v147_v32, %v146_v30  ;;  %s2682_s15 = sld [smem:[#allocation2 + $0x7]]  ;;  %s2681_s17 = sld [smem:[#allocation2 + $0x6]] }
  0x82   :  { %v143_v36 = vld [vmem:[#allocation7 + $0x18] sm:$0xff]  ;;  %v3899_v38 = vpack.c.bf16 %v141_v34, %v140_v33  ;;  %v2658_v40 = vld [vmem:[%s4257_s1 + $0x2] sm:$0x3]  ;;  %s2668_s1 = sld [smem:[#allocation2 + $0x3]]  ;;  %v3940_v51 = vld [vmem:[%s4263_s7] ss:$0 sm:$0xff] }
  0x83   :  { %3143 = vmatpush3.bf16.msra.mxu1 %v3894_v31  ;;  %v3903_v39 = vpack.c.bf16 %v143_v36, %v142_v35  ;;  %v2659_v61 = vld [vmem:[%s4258_s2 + $0x2] sm:$0x3]  ;;  %s2675_s2 = sld [smem:[#allocation2 + $0x5]]  ;;  %s2689_s4 = sld [smem:[#allocation2 + $0x9]] }
  0x84   :  { %3140 = vmatpush3.bf16.msra.mxu0 %v3873_v7  ;;  %s160_s29 = scalar_lea.vmem [#allocation6], %s2660_s22  ;;  %s157_s23 = scalar_lea.vmem [#allocation6], %s156_s6  ;;  %3144 = vmatprep.subr.bf16.mxu1 %v3675_v3 }
  0x85   :  { %3147 = vmatprep.subr.bf16.mxu0 %v3675_v3  ;;  %v161_v9 = vld [vmem:[%s160_s29] sm:$0x1]  ;;  %s2688_s22 = sld [smem:[#allocation2 + $0x8]]  ;;  %s2695_s27 = sld [smem:[#allocation2 + $0xa]] }
  0x86   :  { %v163_v10 = vrot.slane %v161_v9, 7  ;;  %v158_v11 = vld [vmem:[%s157_s23] sm:$0x1]  ;;  %s454_s16 = scalar_lea.vmem [#allocation6], %s2667_s30  ;;  %s734_s10 = scalar_lea.vmem [#allocation6], %s2674_s5 }
  0x87   :  { %2858 = vmatmul.mubr.msk.f32.vlgmr.msra.gmra.mrb[0].mxu0 %vm167_vm1, %v149_v8  ;;  %3146 = vmatpush3.bf16.msra.mxu1 %v3897_v37  ;;  %v455_v49 = vld [vmem:[%s454_s16] sm:$0x1]  ;;  %s1017_s18 = scalar_lea.vmem [#allocation6], %s2682_s15  ;;  %s1014_s19 = scalar_lea.vmem [#allocation6], %s2681_s17 }
  0x88   :  { %2879 = vmatprep.mubr.msk.f32.mxu0 %vm3676_vm0, %v3677_v6  ;;  %v166_v12 = vsel %vm165_vm2, %v158_v11, %v163_v10  ;;  %3149 = vmatpush3.bf16.msra.mxu0 %v3899_v38  ;;  %s457_s14 = scalar_lea.vmem [#allocation6], %s2668_s1  ;;  %s2696_s23 = sld [smem:[#allocation2 + $0xb]] }
  0x89   :  { %3150 = vmatprep.subr.bf16.mxu0 %v3675_v3  ;;  %3153 = vmatprep.subr.bf16.mxu1 %v3675_v3  ;;  %v458_v47 = vld [vmem:[%s457_s14] sm:$0x1]  ;;  %s737_s26 = scalar_lea.vmem [#allocation6], %s2675_s2  ;;  %s1297_s6 = scalar_lea.vmem [#allocation6], %s2689_s4 }
  0x8a   :  { %2869 = vmatmul.mubr.msk.f32.vlgmr.msra.gmra.mrb[0].mxu1 %vm167_vm1, %v2658_v40  ;;  %v460_v48 = vrot.slane %v458_v47, 7  ;;  %v738_v32 = vld [vmem:[%s737_s26] sm:$0x1]  ;;  %s2703_s25 = sld [smem:[#allocation2 + $0xd]]  ;;  %s2702_s1 = sld [smem:[#allocation2 + $0xc]] }
  0x8b   :  { %3155 = vmatpush3.bf16.msra.mxu1 %v3862_v4  ;;  %2890 = vmatprep.mubr.msk.f32.mxu1 %vm3676_vm0, %v3677_v6  ;;  %v740_v36 = vrot.slane %v738_v32, 7  ;;  %s1294_s29 = scalar_lea.vmem [#allocation6], %s2688_s22  ;;  %s1574_s3 = scalar_lea.vmem [#allocation6], %s2695_s27 }
  0x8c   :  { %3152 = vmatpush3.bf16.msra.mxu0 %v3903_v39  ;;  %3156 = vmatprep.subr.bf16.mxu1 %v3675_v3  ;;  %v462_v50 = vsel %vm165_vm2, %v455_v49, %v460_v48  ;;  %s2712_s16 = sld [smem:[#allocation2 + $0xf]]  ;;  %s2711_s9 = sld [smem:[#allocation2 + $0xe]] }
  0x8d   :  { %3159 = vmatprep.subr.bf16.mxu0 %v3675_v3 }
  0x8e   :  { %s1577_s8 = scalar_lea.vmem [#allocation6], %s2696_s23 }
  0x8f   :  { %3158 = vmatpush3.bf16.msra.mxu1 %v3873_v7 }
  0x90   :  { %3165 = vmatprep.subr.bf16.mxu1 %v3675_v3  ;;  %s1857_s30 = scalar_lea.vmem [#allocation6], %s2703_s25  ;;  %s1854_s14 = scalar_lea.vmem [#allocation6], %s2702_s1 }
  0x92   :  { %s2223_s20 = scalar_lea.vmem [#allocation6], %s2712_s16  ;;  %s2220_s21 = scalar_lea.vmem [#allocation6], %s2711_s9 }
 0x15a   :  { %v237_v13 = vpop.f32.mrb[0].mxu0 }
 0x15b   :  { %v241_v14 = vadd.f32 %v237_v13, %v166_v12  ;;  %v2859_v15 = vpop.f32.mrb[1].mxu0 }
 0x15d   :  { %3313 = vtanh.f32 %v241_v14  ;;  %v2662_v18 = vmul.f32 -1.442695, %v241_v14  ;;  %v339_v44 = vpop.f32.mrb[0].mxu1 }
 0x15e   :  { %v2870_v45 = vpop.f32.mrb[1].mxu1 }
 0x15f   :  { %3315 = vpow2.f32 %v2662_v18 }
 0x167   :  { %v3314_v16 = vpop.eup %3313 }
 0x168   :  { %255 = vrot.lane.b32.xlu0 %v3314_v16, %s3678_s24 }
 0x169   :  { %v3316_v19 = vpop.eup %3315 }
 0x16a   :  { %v245_v20 = vadd.f32 1.0, %v3316_v19 }
 0x16c   :  { %250 = vrot.lane.b32.xlu0 %v150_v17, %s3679_s28  ;;  %3317 = vrcp.f32 %v245_v20 }
 0x176   :  { %v3318_v21 = vpop.eup %3317 }
 0x1da   :  { %v256_v22 = vpop.permute.xlu0 %255 }
 0x1db   :  { %v258_v23 = vmul.f32 %v3318_v21, %v256_v22 }
 0x1dd   :  { %260 = vrot.lane.b32.xlu1 %v258_v23, %s3679_s28 }
 0x1de   :  { %v251_v24 = vpop.permute.xlu0 %250 }
 0x1df   :  { %v253_v25 = vmul.f32 %v3318_v21, %v251_v24 }
 0x24f   :  { %v261_v26 = vpop.permute.xlu1 %260 }
 0x250   :  { %v3891_v27 = vadd.f32 %v261_v26, %v253_v25 }
 0x252   :  { %3319 = vtanh.f32 %v3891_v27 }
 0x25c   :  { %v3320_v41 = vpop.eup %3319 }
 0x25d   :  { %266 = vrot.lane.b32.xlu1 %v3320_v41, %s3678_s24  ;;  %v735_v41 = vld [vmem:[%s734_s10] sm:$0x1] }
 0x2cf   :  { %v267_v42 = vpop.permute.xlu1 %266 }
 0x2d0   :  { %v269_v43 = vmul.f32 %v3318_v21, %v267_v42  ;;  %v742_v42 = vsel %vm165_vm2, %v735_v41, %v740_v36 }
 0x2d2   :  { %344 = vrot.lane.b32.xlu0 %v269_v43, %s3679_s28 }
 0x344   :  { %v345_v46 = vpop.permute.xlu0 %344 }
 0x345   :  { %2880 = vmatmul.mubr.msk.f32.vlgmr.msra.gmra.mrb[2].mxu0 %vm167_vm1, %v345_v46  ;;  %2891 = vmatmul.mubr.msk.f32.vlgmr.msra.gmra.mrb[2].mxu1 %vm167_vm1, %v345_v46 }
 0x346   :  { %3167 = vmatpush3.bf16.msra.mxu1 %v3899_v38  ;;  %3161 = vmatpush3.bf16.msra.mxu0 %v3894_v31 }
 0x347   :  { %3168 = vmatprep.subr.bf16.mxu1 %v3675_v3  ;;  %3162 = vmatprep.subr.bf16.mxu0 %v3675_v3 }
 0x348   :  { %2912 = vmatprep.mubr.msk.f32.mxu1 %vm3676_vm0, %v3677_v6  ;;  %2901 = vmatprep.mubr.msk.f32.mxu0 %vm3676_vm0, %v3677_v6 }
 0x34a   :  { %3170 = vmatpush3.bf16.msra.mxu1 %v3903_v39  ;;  %3164 = vmatpush3.bf16.msra.mxu0 %v3897_v37 }
 0x34b   :  { %3171 = vmatprep.subr.bf16.mxu0 %v3675_v3  ;;  %3177 = vmatprep.subr.bf16.mxu1 %v3675_v3 }
 0x418   :  { %v414_v52 = vpop.f32.mrb[2].mxu0  ;;  %v529_v53 = vpop.f32.mrb[2].mxu1 }
 0x419   :  { %v415_v54 = vadd.f32 %v414_v52, %v339_v44  ;;  %v533_v55 = vadd.f32 %v529_v53, %v462_v50  ;;  %v2881_v56 = vpop.f32.mrb[3].mxu0  ;;  %v2892_v57 = vpop.f32.mrb[3].mxu1 }
 0x41b   :  { %v424_v58 = vadd.f32 %v3940_v51, %v415_v54  ;;  %3321 = vtanh.f32 %v533_v55  ;;  %v2670_v62 = vmul.f32 -1.442695, %v533_v55 }
 0x41d   :  { %3323 = vtanh.f32 %v424_v58  ;;  %v2666_v63 = vmul.f32 -1.442695, %v424_v58 }
 0x41e   :  { %3325 = vpow2.f32 %v2670_v62 }
 0x41f   :  { %3327 = vpow2.f32 %v2666_v63 }
 0x425   :  { %v3322_v59 = vpop.eup %3321 }
 0x426   :  { %543 = vrot.lane.b32.xlu0 %v3322_v59, %s3678_s24 }
 0x427   :  { %v3324_v60 = vpop.eup %3323 }
 0x428   :  { %438 = vrot.lane.b32.xlu1 %v3324_v60, %s3678_s24  ;;  %v3326_v0 = vpop.eup %3325 }
 0x429   :  { %v3328_v1 = vpop.eup %3327  ;;  %v537_v2 = vadd.f32 1.0, %v3326_v0 }
 0x42a   :  { %v428_v5 = vadd.f32 1.0, %v3328_v1 }
 0x42b   :  { %3329 = vrcp.f32 %v537_v2 }
 0x42c   :  { %433 = vrot.lane.b32.xlu1 %v2659_v61, %s3679_s28  ;;  %3331 = vrcp.f32 %v428_v5 }
 0x435   :  { %v3330_v8 = vpop.eup %3329 }
 0x436   :  { %v3332_v11 = vpop.eup %3331  ;;  %v541_v15 = vmul.f32 %v3330_v8, %v3891_v27 }
 0x498   :  { %v544_v9 = vpop.permute.xlu0 %543 }
 0x499   :  { %v546_v10 = vmul.f32 %v3330_v8, %v544_v9 }
 0x49a   :  { %v439_v12 = vpop.permute.xlu1 %438 }
 0x49b   :  { %v441_v13 = vmul.f32 %v3332_v11, %v439_v12  ;;  %548 = vrot.lane.b32.xlu1 %v546_v10, %s3679_s28 }
 0x49d   :  { %443 = vrot.lane.b32.xlu0 %v441_v13, %s3679_s28 }
 0x49e   :  { %v434_v14 = vpop.permute.xlu1 %433 }
 0x49f   :  { %v436_v17 = vmul.f32 %v3332_v11, %v434_v14 }
 0x50d   :  { %v549_v16 = vpop.permute.xlu1 %548 }
 0x50e   :  { %v3952_v18 = vadd.f32 %v549_v16, %v541_v15  ;;  %v1018_v15 = vld [vmem:[%s1017_s18] sm:$0x1] }
 0x50f   :  { %v444_v19 = vpop.permute.xlu0 %443 }
 0x510   :  { %3333 = vtanh.f32 %v3952_v18  ;;  %v3955_v20 = vadd.f32 %v444_v19, %v436_v17  ;;  %v1015_v19 = vld [vmem:[%s1014_s19] sm:$0x1] }
 0x512   :  { %3335 = vtanh.f32 %v3955_v20 }
 0x51a   :  { %v3334_v21 = vpop.eup %3333 }
 0x51b   :  { %554 = vrot.lane.b32.xlu1 %v3334_v21, %s3678_s24 }
 0x51c   :  { %v3336_v22 = vpop.eup %3335 }
 0x51d   :  { %449 = vrot.lane.b32.xlu0 %v3336_v22, %s3678_s24 }
 0x58d   :  { %v555_v23 = vpop.permute.xlu1 %554 }
 0x58e   :  { %v557_v24 = vmul.f32 %v3330_v8, %v555_v23 }
 0x58f   :  { %v450_v25 = vpop.permute.xlu0 %449 }
 0x590   :  { %v452_v26 = vmul.f32 %v3332_v11, %v450_v25  ;;  %634 = vrot.lane.b32.xlu1 %v557_v24, %s3679_s28 }
 0x592   :  { %559 = vrot.lane.b32.xlu0 %v452_v26, %s3679_s28 }
 0x602   :  { %v635_v27 = vpop.permute.xlu1 %634 }
 0x603   :  { %2913 = vmatmul.mubr.msk.f32.vlgmr.msra.gmra.mrb[4].mxu1 %vm167_vm1, %v635_v27 }
 0x604   :  { %v560_v28 = vpop.permute.xlu0 %559  ;;  %3179 = vmatpush3.bf16.msra.mxu1 %v3894_v31  ;;  %2934 = vmatprep.mubr.msk.f32.mxu1 %vm3676_vm0, %v3677_v6 }
 0x605   :  { %2902 = vmatmul.mubr.msk.f32.vlgmr.msra.gmra.mrb[4].mxu0 %vm167_vm1, %v560_v28  ;;  %3180 = vmatprep.subr.bf16.mxu1 %v3675_v3 }
 0x606   :  { %3173 = vmatpush3.bf16.msra.mxu0 %v3862_v4  ;;  %2923 = vmatprep.mubr.msk.f32.mxu0 %vm3676_vm0, %v3677_v6 }
 0x607   :  { %3174 = vmatprep.subr.bf16.mxu0 %v3675_v3 }
 0x608   :  { %3182 = vmatpush3.bf16.msra.mxu1 %v3897_v37 }
 0x609   :  { %3189 = vmatprep.subr.bf16.mxu1 %v3675_v3 }
 0x60a   :  { %3176 = vmatpush3.bf16.msra.mxu0 %v3873_v7 }
 0x60b   :  { %3183 = vmatprep.subr.bf16.mxu0 %v3675_v3 }
 0x60d   :  { %2924 = vmatmul.mubr.msk.f32.vlgmr.msra.gmra.mrb[6].mxu0 %vm167_vm1, %v635_v27 }
 0x60e   :  { %3185 = vmatpush3.bf16.msra.mxu0 %v3899_v38  ;;  %2945 = vmatprep.mubr.msk.f32.mxu0 %vm3676_vm0, %v3677_v6 }
 0x60f   :  { %3186 = vmatprep.subr.bf16.mxu0 %v3675_v3 }
 0x612   :  { %3188 = vmatpush3.bf16.msra.mxu0 %v3903_v39 }
 0x613   :  { %3195 = vmatprep.subr.bf16.mxu0 %v3675_v3 }
 0x6d6   :  { %v704_v29 = vpop.f32.mrb[4].mxu1 }
 0x6d7   :  { %v2914_v30 = vpop.f32.mrb[5].mxu1 }
 0x6d8   :  { %v629_v33 = vpop.f32.mrb[4].mxu0 }
 0x6d9   :  { %v705_v34 = vadd.f32 %v704_v29, %v629_v33  ;;  %v2903_v35 = vpop.f32.mrb[5].mxu0 }
 0x6db   :  { %v708_v40 = vadd.f32 %v3940_v51, %v705_v34 }
 0x6dd   :  { %3337 = vtanh.f32 %v708_v40  ;;  %v2673_v48 = vmul.f32 -1.442695, %v708_v40 }
 0x6e0   :  { %v809_v43 = vpop.f32.mrb[6].mxu0 }
 0x6e1   :  { %v813_v44 = vadd.f32 %v809_v43, %v742_v42  ;;  %v2925_v45 = vpop.f32.mrb[7].mxu0 }
 0x6e3   :  { %3339 = vtanh.f32 %v813_v44  ;;  %v2677_v49 = vmul.f32 -1.442695, %v813_v44 }
 0x6e4   :  { %3341 = vpow2.f32 %v2673_v48 }
 0x6e5   :  { %3343 = vpow2.f32 %v2677_v49 }
 0x6e7   :  { %v3338_v46 = vpop.eup %3337 }
 0x6e8   :  { %718 = vrot.lane.b32.xlu0 %v3338_v46, %s3678_s24 }
 0x6ed   :  { %v3340_v47 = vpop.eup %3339 }
 0x6ee   :  { %823 = vrot.lane.b32.xlu1 %v3340_v47, %s3678_s24  ;;  %v3342_v50 = vpop.eup %3341 }
 0x6ef   :  { %v712_v52 = vadd.f32 1.0, %v3342_v50  ;;  %v3344_v53 = vpop.eup %3343 }
 0x6f0   :  { %v817_v54 = vadd.f32 1.0, %v3344_v53 }
 0x6f1   :  { %3345 = vrcp.f32 %v712_v52 }
 0x6f2   :  { %3347 = vrcp.f32 %v817_v54 }
 0x6fb   :  { %v3346_v55 = vpop.eup %3345 }
 0x6fc   :  { %v3348_v58 = vpop.eup %3347  ;;  %v716_v61 = vmul.f32 %v3346_v55, %v3955_v20 }
 0x6fd   :  { %v821_v0 = vmul.f32 %v3348_v58, %v3952_v18  ;;  %v1020_v18 = vrot.slane %v1018_v15, 7 }
 0x6ff   :  { %v1022_v21 = vsel %vm165_vm2, %v1015_v19, %v1020_v18 }
 0x75a   :  { %v719_v56 = vpop.permute.xlu0 %718 }
 0x75b   :  { %v721_v57 = vmul.f32 %v3346_v55, %v719_v56 }
 0x75d   :  { %723 = vrot.lane.b32.xlu0 %v721_v57, %s3679_s28 }
 0x760   :  { %v824_v59 = vpop.permute.xlu1 %823 }
 0x761   :  { %v826_v60 = vmul.f32 %v3348_v58, %v824_v59 }
 0x763   :  { %828 = vrot.lane.b32.xlu1 %v826_v60, %s3679_s28 }
 0x7cf   :  { %v724_v62 = vpop.permute.xlu0 %723 }
 0x7d0   :  { %v3990_v63 = vadd.f32 %v724_v62, %v716_v61  ;;  %v1298_v61 = vld [vmem:[%s1297_s6] sm:$0x1] }
 0x7d2   :  { %3349 = vtanh.f32 %v3990_v63 }
 0x7d5   :  { %v829_v1 = vpop.permute.xlu1 %828 }
 0x7d6   :  { %v3994_v2 = vadd.f32 %v829_v1, %v821_v0 }
 0x7d8   :  { %3351 = vtanh.f32 %v3994_v2 }
 0x7dc   :  { %v3350_v5 = vpop.eup %3349 }
 0x7dd   :  { %729 = vrot.lane.b32.xlu0 %v3350_v5, %s3678_s24  ;;  %v1300_v5 = vrot.slane %v1298_v61, 7 }
 0x7e2   :  { %v3352_v8 = vpop.eup %3351 }
 0x7e3   :  { %834 = vrot.lane.b32.xlu1 %v3352_v8, %s3678_s24  ;;  %v1295_v8 = vld [vmem:[%s1294_s29] sm:$0x1] }
 0x84f   :  { %v730_v9 = vpop.permute.xlu0 %729 }
 0x850   :  { %v732_v10 = vmul.f32 %v3346_v55, %v730_v9 }
 0x852   :  { %839 = vrot.lane.b32.xlu0 %v732_v10, %s3679_s28  ;;  %v1302_v10 = vsel %vm165_vm2, %v1295_v8, %v1300_v5 }
 0x855   :  { %v835_v11 = vpop.permute.xlu1 %834 }
 0x856   :  { %v837_v12 = vmul.f32 %v3348_v58, %v835_v11 }
 0x858   :  { %914 = vrot.lane.b32.xlu1 %v837_v12, %s3679_s28 }
 0x8c4   :  { %v840_v13 = vpop.permute.xlu0 %839 }
 0x8c5   :  { %2935 = vmatmul.mubr.msk.f32.vlgmr.msra.gmra.mrb[6].mxu1 %vm167_vm1, %v840_v13 }
 0x8c6   :  { %3191 = vmatpush3.bf16.msra.mxu1 %v3862_v4  ;;  %2956 = vmatprep.mubr.msk.f32.mxu1 %vm3676_vm0, %v3677_v6 }
 0x8c7   :  { %3192 = vmatprep.subr.bf16.mxu1 %v3675_v3 }
 0x8ca   :  { %3194 = vmatpush3.bf16.msra.mxu1 %v3873_v7  ;;  %v915_v14 = vpop.permute.xlu1 %914 }
 0x8cb   :  { %2946 = vmatmul.mubr.msk.f32.vlgmr.msra.gmra.mrb[8].mxu0 %vm167_vm1, %v915_v14  ;;  %3201 = vmatprep.subr.bf16.mxu1 %v3675_v3 }
 0x8cc   :  { %3197 = vmatpush3.bf16.msra.mxu0 %v3894_v31  ;;  %2967 = vmatprep.mubr.msk.f32.mxu0 %vm3676_vm0, %v3677_v6 }
 0x8cd   :  { %2957 = vmatmul.mubr.msk.f32.vlgmr.msra.gmra.mrb[8].mxu1 %vm167_vm1, %v915_v14  ;;  %3198 = vmatprep.subr.bf16.mxu0 %v3675_v3 }
 0x8ce   :  { %3203 = vmatpush3.bf16.msra.mxu1 %v3899_v38  ;;  %2978 = vmatprep.mubr.msk.f32.mxu1 %vm3676_vm0, %v3677_v6 }
 0x8cf   :  { %3204 = vmatprep.subr.bf16.mxu1 %v3675_v3 }
 0x8d0   :  { %3200 = vmatpush3.bf16.msra.mxu0 %v3897_v37 }
 0x8d1   :  { %3207 = vmatprep.subr.bf16.mxu0 %v3675_v3 }
 0x8d2   :  { %3206 = vmatpush3.bf16.msra.mxu1 %v3903_v39 }
 0x8d3   :  { %3213 = vmatprep.subr.bf16.mxu1 %v3675_v3 }
 0x998   :  { %v909_v16 = vpop.f32.mrb[6].mxu1 }
 0x999   :  { %v2936_v17 = vpop.f32.mrb[7].mxu1 }
 0x99e   :  { %v984_v20 = vpop.f32.mrb[8].mxu0 }
 0x99f   :  { %v985_v22 = vadd.f32 %v984_v20, %v909_v16  ;;  %v2947_v23 = vpop.f32.mrb[9].mxu0 }
 0x9a0   :  { %v1089_v24 = vpop.f32.mrb[8].mxu1 }
 0x9a1   :  { %v988_v25 = vadd.f32 %v3940_v51, %v985_v22  ;;  %v1093_v26 = vadd.f32 %v1089_v24, %v1022_v21  ;;  %v2958_v27 = vpop.f32.mrb[9].mxu1 }
 0x9a3   :  { %3353 = vtanh.f32 %v988_v25  ;;  %v2680_v30 = vmul.f32 -1.442695, %v988_v25  ;;  %v2684_v32 = vmul.f32 -1.442695, %v1093_v26 }
 0x9a4   :  { %3355 = vtanh.f32 %v1093_v26 }
 0x9a5   :  { %3357 = vpow2.f32 %v2680_v30 }
 0x9a6   :  { %3359 = vpow2.f32 %v2684_v32 }
 0x9ad   :  { %v3354_v28 = vpop.eup %3353 }
 0x9ae   :  { %v3356_v29 = vpop.eup %3355  ;;  %998 = vrot.lane.b32.xlu0 %v3354_v28, %s3678_s24 }
 0x9af   :  { %1103 = vrot.lane.b32.xlu1 %v3356_v29, %s3678_s24  ;;  %v3358_v33 = vpop.eup %3357 }
 0x9b0   :  { %v3360_v34 = vpop.eup %3359  ;;  %v992_v35 = vadd.f32 1.0, %v3358_v33 }
 0x9b1   :  { %v1097_v36 = vadd.f32 1.0, %v3360_v34 }
 0x9b2   :  { %3361 = vrcp.f32 %v992_v35 }
 0x9b3   :  { %3363 = vrcp.f32 %v1097_v36 }
 0x9bc   :  { %v3362_v40 = vpop.eup %3361 }
 0x9bd   :  { %v3364_v42 = vpop.eup %3363  ;;  %v996_v46 = vmul.f32 %v3362_v40, %v3990_v63 }
 0x9be   :  { %v1101_v47 = vmul.f32 %v3364_v42, %v3994_v2 }
 0xa20   :  { %v999_v41 = vpop.permute.xlu0 %998 }
 0xa21   :  { %v1104_v43 = vpop.permute.xlu1 %1103  ;;  %v1001_v44 = vmul.f32 %v3362_v40, %v999_v41 }
 0xa22   :  { %v1106_v45 = vmul.f32 %v3364_v42, %v1104_v43 }
 0xa23   :  { %1003 = vrot.lane.b32.xlu0 %v1001_v44, %s3679_s28 }
 0xa24   :  { %1108 = vrot.lane.b32.xlu1 %v1106_v45, %s3679_s28 }
 0xa95   :  { %v1004_v48 = vpop.permute.xlu0 %1003 }
 0xa96   :  { %v1109_v49 = vpop.permute.xlu1 %1108  ;;  %v4030_v50 = vadd.f32 %v1004_v48, %v996_v46  ;;  %v1578_v46 = vld [vmem:[%s1577_s8] sm:$0x1] }
 0xa97   :  { %v4032_v52 = vadd.f32 %v1109_v49, %v1101_v47  ;;  %v1580_v49 = vrot.slane %v1578_v46, 7 }
 0xa98   :  { %3365 = vtanh.f32 %v4030_v50 }
 0xa99   :  { %3367 = vtanh.f32 %v4032_v52 }
 0xaa2   :  { %v3366_v53 = vpop.eup %3365 }
 0xaa3   :  { %v3368_v54 = vpop.eup %3367  ;;  %1009 = vrot.lane.b32.xlu0 %v3366_v53, %s3678_s24 }
 0xaa4   :  { %1114 = vrot.lane.b32.xlu1 %v3368_v54, %s3678_s24 }
 0xb15   :  { %v1010_v55 = vpop.permute.xlu0 %1009 }
 0xb16   :  { %v1115_v56 = vpop.permute.xlu1 %1114  ;;  %v1012_v57 = vmul.f32 %v3362_v40, %v1010_v55 }
 0xb17   :  { %v1117_v58 = vmul.f32 %v3364_v42, %v1115_v56 }
 0xb18   :  { %1119 = vrot.lane.b32.xlu0 %v1012_v57, %s3679_s28 }
 0xb19   :  { %1194 = vrot.lane.b32.xlu1 %v1117_v58, %s3679_s28 }
 0xb8a   :  { %v1120_v59 = vpop.permute.xlu0 %1119 }
 0xb8b   :  { %v1195_v60 = vpop.permute.xlu1 %1194  ;;  %2968 = vmatmul.mubr.msk.f32.vlgmr.msra.gmra.mrb[10].mxu0 %vm167_vm1, %v1120_v59 }
 0xb8c   :  { %2979 = vmatmul.mubr.msk.f32.vlgmr.msra.gmra.mrb[10].mxu1 %vm167_vm1, %v1195_v60  ;;  %3209 = vmatpush3.bf16.msra.mxu0 %v3862_v4 }
 0xb8d   :  { %3210 = vmatprep.subr.bf16.mxu0 %v3675_v3  ;;  %2989 = vmatprep.mubr.msk.f32.mxu0 %vm3676_vm0, %v3677_v6 }
 0xb8e   :  { %3215 = vmatpush3.bf16.msra.mxu1 %v3894_v31  ;;  %3000 = vmatprep.mubr.msk.f32.mxu1 %vm3676_vm0, %v3677_v6 }
 0xb8f   :  { %3216 = vmatprep.subr.bf16.mxu1 %v3675_v3 }
 0xb90   :  { %3212 = vmatpush3.bf16.msra.mxu0 %v3873_v7 }
 0xb91   :  { %3219 = vmatprep.subr.bf16.mxu0 %v3675_v3 }
 0xb92   :  { %3218 = vmatpush3.bf16.msra.mxu1 %v3897_v37 }
 0xb93   :  { %2990 = vmatmul.mubr.msk.f32.vlgmr.msra.gmra.mrb[12].mxu0 %vm167_vm1, %v1195_v60  ;;  %3225 = vmatprep.subr.bf16.mxu1 %v3675_v3 }
 0xb94   :  { %3221 = vmatpush3.bf16.msra.mxu0 %v3899_v38  ;;  %3011 = vmatprep.mubr.msk.f32.mxu0 %vm3676_vm0, %v3677_v6 }
 0xb95   :  { %3222 = vmatprep.subr.bf16.mxu0 %v3675_v3 }
 0xb98   :  { %3224 = vmatpush3.bf16.msra.mxu0 %v3903_v39 }
 0xb99   :  { %3231 = vmatprep.subr.bf16.mxu0 %v3675_v3 }
 0xc5e   :  { %v1189_v62 = vpop.f32.mrb[10].mxu0 }
 0xc5f   :  { %v1264_v63 = vpop.f32.mrb[10].mxu1  ;;  %v2969_v0 = vpop.f32.mrb[11].mxu0 }
 0xc60   :  { %v1265_v1 = vadd.f32 %v1264_v63, %v1189_v62  ;;  %v2980_v2 = vpop.f32.mrb[11].mxu1 }
 0xc62   :  { %v1268_v9 = vadd.f32 %v3940_v51, %v1265_v1 }
 0xc64   :  { %3369 = vtanh.f32 %v1268_v9  ;;  %v2687_v16 = vmul.f32 -1.442695, %v1268_v9 }
 0xc66   :  { %v1369_v11 = vpop.f32.mrb[12].mxu0 }
 0xc67   :  { %v1373_v12 = vadd.f32 %v1369_v11, %v1302_v10  ;;  %v2991_v13 = vpop.f32.mrb[13].mxu0 }
 0xc69   :  { %3371 = vtanh.f32 %v1373_v12  ;;  %v2691_v17 = vmul.f32 -1.442695, %v1373_v12 }
 0xc6a   :  { %3373 = vpow2.f32 %v2687_v16 }
 0xc6b   :  { %3375 = vpow2.f32 %v2691_v17 }
 0xc6e   :  { %v3370_v14 = vpop.eup %3369 }
 0xc6f   :  { %1278 = vrot.lane.b32.xlu0 %v3370_v14, %s3678_s24 }
 0xc73   :  { %v3372_v15 = vpop.eup %3371 }
 0xc74   :  { %1383 = vrot.lane.b32.xlu1 %v3372_v15, %s3678_s24  ;;  %v3374_v18 = vpop.eup %3373 }
 0xc75   :  { %v1272_v19 = vadd.f32 1.0, %v3374_v18  ;;  %v3376_v20 = vpop.eup %3375 }
 0xc76   :  { %v1377_v21 = vadd.f32 1.0, %v3376_v20 }
 0xc77   :  { %3377 = vrcp.f32 %v1272_v19 }
 0xc78   :  { %3379 = vrcp.f32 %v1377_v21 }
 0xc81   :  { %v3378_v22 = vpop.eup %3377 }
 0xc82   :  { %v3380_v25 = vpop.eup %3379  ;;  %v1276_v28 = vmul.f32 %v3378_v22, %v4030_v50  ;;  %v1575_v50 = vld [vmem:[%s1574_s3] sm:$0x1] }
 0xc83   :  { %v1381_v32 = vmul.f32 %v3380_v25, %v4032_v52  ;;  %v1582_v55 = vsel %vm165_vm2, %v1575_v50, %v1580_v49 }
 0xce1   :  { %v1279_v23 = vpop.permute.xlu0 %1278 }
 0xce2   :  { %v1281_v24 = vmul.f32 %v3378_v22, %v1279_v23 }
 0xce4   :  { %1283 = vrot.lane.b32.xlu0 %v1281_v24, %s3679_s28 }
 0xce6   :  { %v1384_v26 = vpop.permute.xlu1 %1383 }
 0xce7   :  { %v1386_v27 = vmul.f32 %v3380_v25, %v1384_v26 }
 0xce9   :  { %1388 = vrot.lane.b32.xlu1 %v1386_v27, %s3679_s28 }
 0xd56   :  { %v1284_v29 = vpop.permute.xlu0 %1283 }
 0xd57   :  { %v4068_v30 = vadd.f32 %v1284_v29, %v1276_v28  ;;  %v1858_v28 = vld [vmem:[%s1857_s30] sm:$0x1] }
 0xd59   :  { %3381 = vtanh.f32 %v4068_v30 }
 0xd5b   :  { %v1389_v33 = vpop.permute.xlu1 %1388 }
 0xd5c   :  { %v4072_v34 = vadd.f32 %v1389_v33, %v1381_v32 }
 0xd5e   :  { %3383 = vtanh.f32 %v4072_v34 }
 0xd63   :  { %v3382_v35 = vpop.eup %3381 }
 0xd64   :  { %1289 = vrot.lane.b32.xlu0 %v3382_v35, %s3678_s24  ;;  %v1860_v35 = vrot.slane %v1858_v28, 7 }
 0xd68   :  { %v3384_v36 = vpop.eup %3383 }
 0xd69   :  { %1394 = vrot.lane.b32.xlu1 %v3384_v36, %s3678_s24  ;;  %v1855_v36 = vld [vmem:[%s1854_s14] sm:$0x1] }
 0xdd6   :  { %v1290_v40 = vpop.permute.xlu0 %1289 }
 0xdd7   :  { %v1292_v41 = vmul.f32 %v3378_v22, %v1290_v40 }
 0xdd9   :  { %1399 = vrot.lane.b32.xlu0 %v1292_v41, %s3679_s28  ;;  %v1862_v41 = vsel %vm165_vm2, %v1855_v36, %v1860_v35 }
 0xddb   :  { %v1395_v42 = vpop.permute.xlu1 %1394 }
 0xddc   :  { %v1397_v43 = vmul.f32 %v3380_v25, %v1395_v42 }
 0xdde   :  { %1474 = vrot.lane.b32.xlu1 %v1397_v43, %s3679_s28 }
 0xe4b   :  { %v1400_v44 = vpop.permute.xlu0 %1399 }
 0xe4c   :  { %3001 = vmatmul.mubr.msk.f32.vlgmr.msra.gmra.mrb[12].mxu1 %vm167_vm1, %v1400_v44 }
 0xe4d   :  { %3227 = vmatpush3.bf16.msra.mxu1 %v3862_v4  ;;  %3022 = vmatprep.mubr.msk.f32.mxu1 %vm3676_vm0, %v3677_v6 }
 0xe4e   :  { %3228 = vmatprep.subr.bf16.mxu1 %v3675_v3 }
 0xe50   :  { %v1475_v45 = vpop.permute.xlu1 %1474 }
 0xe51   :  { %3230 = vmatpush3.bf16.msra.mxu1 %v3873_v7  ;;  %3012 = vmatmul.mubr.msk.f32.vlgmr.msra.gmra.mrb[14].mxu0 %vm167_vm1, %v1475_v45 }
 0xe52   :  { %3233 = vmatpush3.bf16.msra.mxu0 %v3894_v31  ;;  %3237 = vmatprep.subr.bf16.mxu1 %v3675_v3 }
 0xe53   :  { %3234 = vmatprep.subr.bf16.mxu0 %v3675_v3  ;;  %3033 = vmatprep.mubr.msk.f32.mxu0 %vm3676_vm0, %v3677_v6 }
 0xe54   :  { %3023 = vmatmul.mubr.msk.f32.vlgmr.msra.gmra.mrb[14].mxu1 %vm167_vm1, %v1475_v45 }
 0xe55   :  { %3239 = vmatpush3.bf16.msra.mxu1 %v3899_v38  ;;  %3044 = vmatprep.mubr.msk.f32.mxu1 %vm3676_vm0, %v3677_v6 }
 0xe56   :  { %3236 = vmatpush3.bf16.msra.mxu0 %v3897_v37  ;;  %3240 = vmatprep.subr.bf16.mxu1 %v3675_v3 }
 0xe57   :  { %3243 = vmatprep.subr.bf16.mxu0 %v3675_v3 }
 0xe59   :  { %3242 = vmatpush3.bf16.msra.mxu1 %v3903_v39 }
 0xe5a   :  { %3249 = vmatprep.subr.bf16.mxu1 %v3675_v3 }
 0xf1f   :  { %v1469_v47 = vpop.f32.mrb[12].mxu1 }
 0xf20   :  { %v3002_v48 = vpop.f32.mrb[13].mxu1 }
 0xf24   :  { %v1544_v52 = vpop.f32.mrb[14].mxu0 }
 0xf25   :  { %v1545_v53 = vadd.f32 %v1544_v52, %v1469_v47  ;;  %v3013_v54 = vpop.f32.mrb[15].mxu0 }
 0xf27   :  { %v1548_v56 = vadd.f32 %v3940_v51, %v1545_v53  ;;  %v1649_v57 = vpop.f32.mrb[14].mxu1 }
 0xf28   :  { %v1653_v58 = vadd.f32 %v1649_v57, %v1582_v55  ;;  %v3024_v59 = vpop.f32.mrb[15].mxu1 }
 0xf29   :  { %3385 = vtanh.f32 %v1548_v56  ;;  %v2694_v62 = vmul.f32 -1.442695, %v1548_v56 }
 0xf2a   :  { %3387 = vtanh.f32 %v1653_v58  ;;  %v2698_v63 = vmul.f32 -1.442695, %v1653_v58 }
 0xf2b   :  { %3389 = vpow2.f32 %v2694_v62 }
 0xf2c   :  { %3391 = vpow2.f32 %v2698_v63 }
 0xf33   :  { %v3386_v60 = vpop.eup %3385 }
 0xf34   :  { %v3388_v61 = vpop.eup %3387  ;;  %1558 = vrot.lane.b32.xlu0 %v3386_v60, %s3678_s24 }
 0xf35   :  { %1663 = vrot.lane.b32.xlu1 %v3388_v61, %s3678_s24  ;;  %v3390_v0 = vpop.eup %3389 }
 0xf36   :  { %v3392_v1 = vpop.eup %3391  ;;  %v1552_v2 = vadd.f32 1.0, %v3390_v0 }
 0xf37   :  { %v1657_v5 = vadd.f32 1.0, %v3392_v1 }
 0xf38   :  { %3393 = vrcp.f32 %v1552_v2 }
 0xf39   :  { %3395 = vrcp.f32 %v1657_v5 }
 0xf42   :  { %v3394_v8 = vpop.eup %3393 }
 0xf43   :  { %v3396_v10 = vpop.eup %3395  ;;  %v1556_v14 = vmul.f32 %v3394_v8, %v4068_v30 }
 0xf44   :  { %v1661_v15 = vmul.f32 %v3396_v10, %v4072_v34 }
 0xfa6   :  { %v1559_v9 = vpop.permute.xlu0 %1558 }
 0xfa7   :  { %v1664_v11 = vpop.permute.xlu1 %1663  ;;  %v1561_v12 = vmul.f32 %v3394_v8, %v1559_v9 }
 0xfa8   :  { %v1666_v13 = vmul.f32 %v3396_v10, %v1664_v11 }
 0xfa9   :  { %1563 = vrot.lane.b32.xlu0 %v1561_v12, %s3679_s28 }
 0xfaa   :  { %1668 = vrot.lane.b32.xlu1 %v1666_v13, %s3679_s28 }
0x101b   :  { %v1564_v16 = vpop.permute.xlu0 %1563 }
0x101c   :  { %v1669_v17 = vpop.permute.xlu1 %1668  ;;  %v4108_v18 = vadd.f32 %v1564_v16, %v1556_v14 }
0x101d   :  { %v4110_v19 = vadd.f32 %v1669_v17, %v1661_v15  ;;  %v2224_v15 = vld [vmem:[%s2223_s20] sm:$0x1] }
0x101e   :  { %3397 = vtanh.f32 %v4108_v18 }
0x101f   :  { %3399 = vtanh.f32 %v4110_v19 }
0x1028   :  { %v3398_v20 = vpop.eup %3397 }
0x1029   :  { %v3400_v21 = vpop.eup %3399  ;;  %1569 = vrot.lane.b32.xlu0 %v3398_v20, %s3678_s24 }
0x102a   :  { %1674 = vrot.lane.b32.xlu1 %v3400_v21, %s3678_s24 }
0x109b   :  { %v1570_v22 = vpop.permute.xlu0 %1569 }
0x109c   :  { %v1675_v23 = vpop.permute.xlu1 %1674  ;;  %v1572_v24 = vmul.f32 %v3394_v8, %v1570_v22 }
0x109d   :  { %v1677_v25 = vmul.f32 %v3396_v10, %v1675_v23 }
0x109e   :  { %1679 = vrot.lane.b32.xlu0 %v1572_v24, %s3679_s28 }
0x109f   :  { %1754 = vrot.lane.b32.xlu1 %v1677_v25, %s3679_s28 }
0x1110   :  { %v1680_v26 = vpop.permute.xlu0 %1679 }
0x1111   :  { %v1755_v27 = vpop.permute.xlu1 %1754  ;;  %3034 = vmatmul.mubr.msk.f32.vlgmr.msra.gmra.mrb[16].mxu0 %vm167_vm1, %v1680_v26 }
0x1112   :  { %3045 = vmatmul.mubr.msk.f32.vlgmr.msra.gmra.mrb[16].mxu1 %vm167_vm1, %v1755_v27  ;;  %3245 = vmatpush3.bf16.msra.mxu0 %v3862_v4 }
0x1113   :  { %3246 = vmatprep.subr.bf16.mxu0 %v3675_v3  ;;  %3055 = vmatprep.mubr.msk.f32.mxu0 %vm3676_vm0, %v3677_v6 }
0x1114   :  { %3251 = vmatpush3.bf16.msra.mxu1 %v3894_v31  ;;  %3066 = vmatprep.mubr.msk.f32.mxu1 %vm3676_vm0, %v3677_v6 }
0x1115   :  { %3252 = vmatprep.subr.bf16.mxu1 %v3675_v3 }
0x1116   :  { %3248 = vmatpush3.bf16.msra.mxu0 %v3873_v7 }
0x1117   :  { %3255 = vmatprep.subr.bf16.mxu0 %v3675_v3 }
0x1118   :  { %3254 = vmatpush3.bf16.msra.mxu1 %v3897_v37 }
0x1119   :  { %3056 = vmatmul.mubr.msk.f32.vlgmr.msra.gmra.mrb[18].mxu0 %vm167_vm1, %v1755_v27  ;;  %3261 = vmatprep.subr.bf16.mxu1 %v3675_v3 }
0x111a   :  { %3257 = vmatpush3.bf16.msra.mxu0 %v3899_v38  ;;  %3077 = vmatprep.mubr.msk.f32.mxu0 %vm3676_vm0, %v3677_v6 }
0x111b   :  { %3258 = vmatprep.subr.bf16.mxu0 %v3675_v3 }
0x111e   :  { %3260 = vmatpush3.bf16.msra.mxu0 %v3903_v39 }
0x111f   :  { %3267 = vmatprep.subr.bf16.mxu0 %v3675_v3 }
0x11e4   :  { %v1749_v29 = vpop.f32.mrb[16].mxu0 }
0x11e5   :  { %v1824_v30 = vpop.f32.mrb[16].mxu1  ;;  %v3035_v32 = vpop.f32.mrb[17].mxu0 }
0x11e6   :  { %v1825_v33 = vadd.f32 %v1824_v30, %v1749_v29  ;;  %v3046_v34 = vpop.f32.mrb[17].mxu1 }
0x11e8   :  { %v1828_v40 = vadd.f32 %v3940_v51, %v1825_v33 }
0x11ea   :  { %3401 = vtanh.f32 %v1828_v40  ;;  %v2701_v47 = vmul.f32 -1.442695, %v1828_v40 }
0x11ec   :  { %v1929_v42 = vpop.f32.mrb[18].mxu0 }
0x11ed   :  { %v1933_v43 = vadd.f32 %v1929_v42, %v1862_v41  ;;  %v3057_v44 = vpop.f32.mrb[19].mxu0 }
0x11ef   :  { %3403 = vtanh.f32 %v1933_v43  ;;  %v2705_v48 = vmul.f32 -1.442695, %v1933_v43 }
0x11f0   :  { %3405 = vpow2.f32 %v2701_v47  ;;  %v2134_v47 = vld [vmem:[#allocation10 + $0x8] sm:$0xff] }
0x11f1   :  { %3407 = vpow2.f32 %v2705_v48  ;;  %v2135_v48 = vld [vmem:[#allocation10 + $0x10] sm:$0xff] }
0x11f4   :  { %v3402_v45 = vpop.eup %3401 }
0x11f5   :  { %1838 = vrot.lane.b32.xlu0 %v3402_v45, %s3678_s24 }
0x11f9   :  { %v3404_v46 = vpop.eup %3403 }
0x11fa   :  { %1943 = vrot.lane.b32.xlu1 %v3404_v46, %s3678_s24  ;;  %v3406_v49 = vpop.eup %3405  ;;  %v2133_v46 = vld [vmem:[#allocation10] sm:$0xff] }
0x11fb   :  { %v1832_v50 = vadd.f32 1.0, %v3406_v49  ;;  %v3408_v52 = vpop.eup %3407  ;;  %v3262_v49 = vpack.c.bf16 %v2134_v47, %v2133_v46 }
0x11fc   :  { %v1937_v53 = vadd.f32 1.0, %v3408_v52 }
0x11fd   :  { %3409 = vrcp.f32 %v1832_v50  ;;  %v2136_v50 = vld [vmem:[#allocation10 + $0x18] sm:$0xff] }
0x11fe   :  { %3411 = vrcp.f32 %v1937_v53  ;;  %v3265_v52 = vpack.c.bf16 %v2136_v50, %v2135_v48 }
0x1207   :  { %v3410_v54 = vpop.eup %3409 }
0x1208   :  { %v3412_v57 = vpop.eup %3411  ;;  %v1836_v60 = vmul.f32 %v3410_v54, %v4108_v18  ;;  %v2226_v18 = vrot.slane %v2224_v15, 7  ;;  %v2495_v15 = vld [vmem:[#allocation12 + $0x8] sm:$0xff] }
0x1209   :  { %v1941_v63 = vmul.f32 %v3412_v57, %v4110_v19 }
0x1267   :  { %v1839_v55 = vpop.permute.xlu0 %1838 }
0x1268   :  { %v1841_v56 = vmul.f32 %v3410_v54, %v1839_v55 }
0x126a   :  { %1843 = vrot.lane.b32.xlu0 %v1841_v56, %s3679_s28 }
0x126c   :  { %v1944_v58 = vpop.permute.xlu1 %1943 }
0x126d   :  { %v1946_v59 = vmul.f32 %v3412_v57, %v1944_v58 }
0x126f   :  { %1948 = vrot.lane.b32.xlu1 %v1946_v59, %s3679_s28 }
0x12dc   :  { %v1844_v61 = vpop.permute.xlu0 %1843 }
0x12dd   :  { %v4146_v62 = vadd.f32 %v1844_v61, %v1836_v60 }
0x12df   :  { %3413 = vtanh.f32 %v4146_v62 }
0x12e1   :  { %v1949_v0 = vpop.permute.xlu1 %1948 }
0x12e2   :  { %v4150_v1 = vadd.f32 %v1949_v0, %v1941_v63 }
0x12e4   :  { %3415 = vtanh.f32 %v4150_v1 }
0x12e9   :  { %v3414_v2 = vpop.eup %3413 }
0x12ea   :  { %1849 = vrot.lane.b32.xlu0 %v3414_v2, %s3678_s24 }
0x12ee   :  { %v3416_v5 = vpop.eup %3415 }
0x12ef   :  { %1954 = vrot.lane.b32.xlu1 %v3416_v5, %s3678_s24 }
0x135c   :  { %v1850_v8 = vpop.permute.xlu0 %1849 }
0x135d   :  { %v1852_v9 = vmul.f32 %v3410_v54, %v1850_v8 }
0x135f   :  { %1959 = vrot.lane.b32.xlu0 %v1852_v9, %s3679_s28 }
0x1361   :  { %v1955_v10 = vpop.permute.xlu1 %1954 }
0x1362   :  { %v1957_v11 = vmul.f32 %v3412_v57, %v1955_v10 }
0x1364   :  { %2034 = vrot.lane.b32.xlu1 %v1957_v11, %s3679_s28 }
0x13d1   :  { %v1960_v12 = vpop.permute.xlu0 %1959 }
0x13d2   :  { %3067 = vmatmul.mubr.msk.f32.vlgmr.msra.gmra.mrb[18].mxu1 %vm167_vm1, %v1960_v12 }
0x13d3   :  { %3088 = vmatprep.mubr.msk.f32.mxu1 %vm3676_vm0, %v3677_v6  ;;  %3263 = vmatpush3.bf16.msra.mxu1 %v3262_v49 }
0x13d4   :  { %3264 = vmatprep.subr.bf16.mxu1 %v3675_v3 }
0x13d6   :  { %v2035_v13 = vpop.permute.xlu1 %2034 }
0x13d7   :  { %3078 = vmatmul.mubr.msk.f32.vlgmr.msra.gmra.mrb[20].mxu0 %vm167_vm1, %v2035_v13  ;;  %3266 = vmatpush3.bf16.msra.mxu1 %v3265_v52 }
0x13d8   :  { %3269 = vmatpush3.bf16.msra.mxu0 %v3862_v4  ;;  %3099 = vmatprep.mubr.msk.f32.mxu0 %vm3676_vm0, %v3677_v6 }
0x13d9   :  { %3270 = vmatprep.subr.bf16.mxu0 %v3675_v3  ;;  %3273 = vmatprep.subr.bf16.mxu1 %v3675_v3 }
0x13dc   :  { %3272 = vmatpush3.bf16.msra.mxu0 %v3873_v7 }
0x13dd   :  { %3279 = vmatprep.subr.bf16.mxu0 %v3675_v3 }
0x13df   :  { %3100 = vmatmul.mubr.msk.f32.vlgmr.msra.gmra.mrb[22].mxu0 %vm167_vm1, %v2035_v13 }
0x13e0   :  { %3281 = vmatpush3.bf16.msra.mxu0 %v3899_v38  ;;  %3121 = vmatprep.mubr.msk.f32.mxu0 %vm3676_vm0, %v3677_v6  ;;  %v2221_v38 = vld [vmem:[%s2220_s21] sm:$0x1] }
0x13e1   :  { %3282 = vmatprep.subr.bf16.mxu0 %v3675_v3  ;;  %v2228_v20 = vsel %vm165_vm2, %v2221_v38, %v2226_v18 }
0x13e4   :  { %3284 = vmatpush3.bf16.msra.mxu0 %v3903_v39 }
0x14a5   :  { %v2029_v4 = vpop.f32.mrb[18].mxu1 }
0x14a6   :  { %v3068_v14 = vpop.f32.mrb[19].mxu1 }
0x14a7   :  { %v2494_v14 = vld [vmem:[#allocation12] sm:$0xff] }
0x14aa   :  { %v2104_v7 = vpop.f32.mrb[20].mxu0 }
0x14ab   :  { %v2105_v16 = vadd.f32 %v2104_v7, %v2029_v4  ;;  %v3079_v17 = vpop.f32.mrb[21].mxu0  ;;  %v2496_v7 = vld [vmem:[#allocation12 + $0x10] sm:$0xff] }
0x14ac   :  { %v2497_v17 = vld [vmem:[#allocation12 + $0x18] sm:$0xff] }
0x14ad   :  { %v2108_v19 = vadd.f32 %v3940_v51, %v2105_v16  ;;  %v3286_v16 = vpack.c.bf16 %v2495_v15, %v2494_v14  ;;  %v3289_v18 = vpack.c.bf16 %v2497_v17, %v2496_v7 }
0x14af   :  { %3417 = vtanh.f32 %v2108_v19  ;;  %v2708_v25 = vmul.f32 -1.442695, %v2108_v19 }
0x14b2   :  { %v2295_v21 = vpop.f32.mrb[22].mxu0 }
0x14b3   :  { %v2299_v22 = vadd.f32 %v2295_v21, %v2228_v20  ;;  %v3101_v39 = vpop.f32.mrb[23].mxu0 }
0x14b5   :  { %3419 = vtanh.f32 %v2299_v22  ;;  %v2714_v26 = vmul.f32 -1.442695, %v2299_v22 }
0x14b6   :  { %3421 = vpow2.f32 %v2708_v25 }
0x14b7   :  { %3423 = vpow2.f32 %v2714_v26 }
0x14b9   :  { %v3418_v23 = vpop.eup %3417 }
0x14ba   :  { %2118 = vrot.lane.b32.xlu0 %v3418_v23, %s3678_s24 }
0x14bf   :  { %v3420_v24 = vpop.eup %3419 }
0x14c0   :  { %2309 = vrot.lane.b32.xlu1 %v3420_v24, %s3678_s24  ;;  %v3422_v51 = vpop.eup %3421 }
0x14c1   :  { %v2112_v27 = vadd.f32 1.0, %v3422_v51  ;;  %v3424_v28 = vpop.eup %3423 }
0x14c2   :  { %v2303_v29 = vadd.f32 1.0, %v3424_v28 }
0x14c3   :  { %3425 = vrcp.f32 %v2112_v27 }
0x14c4   :  { %3427 = vrcp.f32 %v2303_v29 }
0x14cd   :  { %v3426_v30 = vpop.eup %3425 }
0x14ce   :  { %v3428_v34 = vpop.eup %3427  ;;  %v2116_v40 = vmul.f32 %v3426_v30, %v4146_v62 }
0x14cf   :  { %v2307_v43 = vmul.f32 %v3428_v34, %v4150_v1 }
0x152c   :  { %v2119_v32 = vpop.permute.xlu0 %2118 }
0x152d   :  { %v2121_v33 = vmul.f32 %v3426_v30, %v2119_v32 }
0x152f   :  { %2123 = vrot.lane.b32.xlu0 %v2121_v33, %s3679_s28 }
0x1532   :  { %v2310_v35 = vpop.permute.xlu1 %2309 }
0x1533   :  { %v2312_v36 = vmul.f32 %v3428_v34, %v2310_v35 }
0x1535   :  { %2314 = vrot.lane.b32.xlu1 %v2312_v36, %s3679_s28 }
0x15a1   :  { %v2124_v41 = vpop.permute.xlu0 %2123 }
0x15a2   :  { %v2126_v42 = vadd.f32 %v2124_v41, %v2116_v40 }
0x15a4   :  { %3429 = vtanh.f32 %v2126_v42 }
0x15a7   :  { %v2315_v44 = vpop.permute.xlu1 %2314 }
0x15a8   :  { %v4181_v45 = vadd.f32 %v2315_v44, %v2307_v43 }
0x15aa   :  { %3431 = vtanh.f32 %v4181_v45 }
0x15ae   :  { %v3430_v53 = vpop.eup %3429 }
0x15af   :  { %2129 = vrot.lane.b32.xlu0 %v3430_v53, %s3678_s24 }
0x15b4   :  { %v3432_v54 = vpop.eup %3431 }
0x15b5   :  { %2320 = vrot.lane.b32.xlu1 %v3432_v54, %s3678_s24 }
0x1621   :  { %v2130_v55 = vpop.permute.xlu0 %2129 }
0x1622   :  { %v2132_v56 = vmul.f32 %v3426_v30, %v2130_v55 }
0x1624   :  { %2138 = vrot.lane.b32.xlu0 %v2132_v56, %s3679_s28 }
0x1627   :  { %v2321_v57 = vpop.permute.xlu1 %2320 }
0x1628   :  { %v2323_v58 = vmul.f32 %v3428_v34, %v2321_v57 }
0x162a   :  { %2395 = vrot.lane.b32.xlu1 %v2323_v58, %s3679_s28 }
0x1696   :  { %v2139_v59 = vpop.permute.xlu0 %2138 }
0x1697   :  { %3089 = vmatmul.mubr.msk.f32.vlgmr.msra.gmra.mrb[20].mxu1 %vm167_vm1, %v2139_v59 }
0x1698   :  { %3275 = vmatpush3.bf16.msra.mxu1 %v3894_v31  ;;  %3110 = vmatprep.mubr.msk.f32.mxu1 %vm3676_vm0, %v3677_v6 }
0x1699   :  { %3276 = vmatprep.subr.bf16.mxu1 %v3675_v3 }
0x169c   :  { %3278 = vmatpush3.bf16.msra.mxu1 %v3897_v37  ;;  %v2396_v60 = vpop.permute.xlu1 %2395  ;;  %v3441_v37 = vld [vmem:[%s4263_s7] ss:$0 sm:$0xff]  ;;  %s3680_s7 = smov 96  }
0x169d   :  { %2576 = vst.msk [vmem:[#allocation16] sm:$0x3] %vm2575_vm3, %v2396_v60  ;;  %3122 = vmatmul.mubr.msk.f32.vlgmr.msra.gmra.mrb[24].mxu0 %vm167_vm1, %v2396_v60  ;;  %3285 = vmatprep.subr.bf16.mxu1 %v3675_v3 }
0x169f   :  { %3111 = vmatmul.mubr.msk.f32.vlgmr.msra.gmra.mrb[22].mxu1 %vm167_vm1, %v2139_v59 }
0x16a0   :  { %3132 = vmatprep.mubr.msk.f32.mxu1 %vm3676_vm0, %v3677_v6  ;;  %3287 = vmatpush3.bf16.msra.mxu1 %v3286_v16 }
0x16a1   :  { %3288 = vmatprep.subr.bf16.mxu1 %v3675_v3 }
0x16a4   :  { %3290 = vmatpush3.bf16.msra.mxu1 %v3289_v18 }
0x1770   :  { %v2465_v31 = vpop.f32.mrb[24].mxu0 }
0x1771   :  { %v3123_v61 = vpop.f32.mrb[25].mxu0 }
0x1772   :  { %v2390_v62 = vpop.f32.mrb[22].mxu1 }
0x1773   :  { %v2466_v63 = vadd.f32 %v2465_v31, %v2390_v62  ;;  %v3112_v0 = vpop.f32.mrb[23].mxu1 }
0x1775   :  { %v2469_v1 = vadd.f32 %v3441_v37, %v2466_v63 }
0x1777   :  { %3433 = vtanh.f32 %v2469_v1  ;;  %v2717_v5 = vmul.f32 -1.442695, %v2469_v1 }
0x1779   :  { %3435 = vpow2.f32 %v2717_v5 }
0x1781   :  { %v3434_v2 = vpop.eup %3433 }
0x1782   :  { %2479 = vrot.lane.b32.xlu0 %v3434_v2, %s3678_s24 }
0x1783   :  { %v3436_v8 = vpop.eup %3435 }
0x1784   :  { %v2473_v9 = vadd.f32 1.0, %v3436_v8 }
0x1786   :  { %3437 = vrcp.f32 %v2473_v9 }
0x1790   :  { %v3438_v6 = vpop.eup %3437 }
0x1791   :  { %v2477_v12 = vmul.f32 %v3438_v6, %v2126_v42 }
0x17f4   :  { %v2480_v10 = vpop.permute.xlu0 %2479 }
0x17f5   :  { %v2482_v11 = vmul.f32 %v3438_v6, %v2480_v10 }
0x17f7   :  { %2484 = vrot.lane.b32.xlu1 %v2482_v11, %s3679_s28 }
0x1869   :  { %v2485_v13 = vpop.permute.xlu1 %2484 }
0x186a   :  { %v2487_v4 = vadd.f32 %v2485_v13, %v2477_v12 }
0x186c   :  { %3439 = vtanh.f32 %v2487_v4 }
0x1876   :  { %v3440_v19 = vpop.eup %3439 }
0x1877   :  { %2490 = vrot.lane.b32.xlu0 %v3440_v19, %s3678_s24  ;;  %s3681_s24 = smov [#allocation16]  }
0x1878   :  { %s2607_s5 = sshll.u32 %s3681_s24, 4  ;;  %s2608_s5 = int_to_ptr.vmem [resolvable:$true] %s2607_s5 }
0x1879   :  { %s3586_s26 = scalar_lea.vmem %s2608_s5, 64  ;;  %p3591_p12 = scmp.lt.s32.totalorder %s2608_s5, %s2608_s5 }
0x187a   :  { %p3587_p11 = scmp.ne.s32.totalorder %s2608_s5, %s3586_s26  ;;  %p3592_p13 = scmp.lt.s32.totalorder %s3586_s26, %s3586_s26 }
0x187b   :  { %2578 = vrot.lane.b32.xlu0 %v4181_v45, %s3680_s7 }
0x187c   :  { %p3593_p0 = por %p3592_p13, %p3591_p12 }
0x187e   :  { %p3594_p1 = pnand %p3593_p0, %p3587_p11 }
0x18e9   :  { %v2491_v38 = vpop.permute.xlu0 %2490 }
0x18ea   :  { %v2493_v20 = vmul.f32 %v3438_v6, %v2491_v38 }
0x18ec   :  { %2499 = vrot.lane.b32.xlu1 %v2493_v20, %s3679_s28 }
0x18ed   :  { %v2579_v21 = vpop.permute.xlu0 %2578 }
0x18ee   :  { %2581 = vst.msk [vmem:[#allocation18] sm:$0x3] %vm2575_vm3, %v2579_v21 }
0x18f0   :  { %2586 = vrot.lane.b32.xlu1 %v2487_v4, %s3680_s7 }
0x195e   :  { %v2500_v22 = vpop.permute.xlu1 %2499 }
0x195f   :  { %2584 = vst.msk [vmem:[#allocation16 + $0x2] sm:$0x3] %vm2575_vm3, %v2500_v22  ;;  %3133 = vmatmul.mubr.msk.f32.vlgmr.msra.gmra.mrb[20].mxu1 %vm167_vm1, %v2500_v22 }
0x1962   :  { %v2587_v3 = vpop.permute.xlu1 %2586 }
0x1963   :  { %2590 = vst.msk [vmem:[#allocation18 + $0x2] sm:$0x3] %vm2575_vm3, %v2587_v3 }
0x1964   :  { %3597 = shalt.err (!%p3594_p1)
}
0x1965   :  { %s3598_s17 = scalar_lea.hbm %s4268_s12, 64 }
0x1966   :  { %p3599_p2 = scmp.ne.s32.totalorder %s4268_s12, %s3598_s17  ;;  %p3602_p3 = scmp.lt.u32.totalorder %s3598_s17, %s4268_s12 }
0x1968   :  { %p3604_p4 = pnand %p3602_p3, %p3599_p2 }
0x196a   :  { %3607 = shalt.err (!%p3604_p4)
}
0x196b   :  { %s3682_s6 = smov 2   ;;  %s3683_s27 = smov [#allocation18]  }
0x196c   :  { %2613 = dma.vmem_to_hbm [thread:$0]  %s2608_s5, 64, %s4268_s12, [#allocation17], %s3679_s28, %s3679_s28, %s3682_s6  }
0x196d   :  { %s2619_s8 = sshll.u32 %s3683_s27, 4  ;;  %s2620_s8 = int_to_ptr.vmem [resolvable:$true] %s2619_s8 }
0x196e   :  { %s3608_s3 = scalar_lea.vmem %s2620_s8, 64  ;;  %p3613_p6 = scmp.lt.s32.totalorder %s2620_s8, %s2620_s8 }
0x196f   :  { %p3609_p5 = scmp.ne.s32.totalorder %s2620_s8, %s3608_s3  ;;  %p3614_p7 = scmp.lt.s32.totalorder %s3608_s3, %s3608_s3 }
0x1971   :  { %p3615_p8 = por %p3614_p7, %p3613_p6 }
0x1973   :  { %p3616_p9 = pnand %p3615_p8, %p3609_p5 }
0x1975   :  { %3619 = shalt.err (!%p3616_p9)
}
0x1976   :  { %s3620_s30 = scalar_lea.hbm %s4269_s13, 64 }
0x1977   :  { %p3621_p10 = scmp.ne.s32.totalorder %s4269_s13, %s3620_s30  ;;  %p3624_p11 = scmp.lt.u32.totalorder %s3620_s30, %s4269_s13 }
0x1979   :  { %p3626_p12 = pnand %p3624_p11, %p3621_p10 }
0x197b   :  { %3629 = shalt.err (!%p3626_p12)
}
0x197c   :  { %2625 = dma.vmem_to_hbm [thread:$0]  %s2620_s8, 64, %s4269_s13, [#allocation17], %s3679_s28, %s3679_s28, %s3682_s6   ;;  %v2710_v39 = vld [vmem:[#allocation13] ss:$0 sm:$0xff] }
0x197d   :  { %s3684_s0 = smov [#allocation15]  }
0x197e   :  { %s2598_s2 = sshll.u32 %s3684_s0, 4  ;;  %s2599_s2 = int_to_ptr.vmem [resolvable:$true] %s2598_s2 }
0x197f   :  { %s3630_s7 = scalar_lea.vmem %s2599_s2, 32  ;;  %p3635_p0 = scmp.lt.s32.totalorder %s2599_s2, %s2599_s2 }
0x1980   :  { %p3631_p13 = scmp.ne.s32.totalorder %s2599_s2, %s3630_s7  ;;  %p3636_p1 = scmp.lt.s32.totalorder %s3630_s7, %s3630_s7 }
0x1982   :  { %p3637_p2 = por %p3636_p1, %p3635_p0 }
0x1984   :  { %p3638_p3 = pnand %p3637_p2, %p3631_p13 }
0x1a32   :  { %v2569_v23 = vpop.f32.mrb[20].mxu1 }
0x1a33   :  { %v3291_v24 = vadd.f32 %v2710_v39, %v2569_v23  ;;  %v3134_v25 = vpop.f32.mrb[21].mxu1 }
0x1a35   :  { %2591 = vst.msk [vmem:[#allocation15] sm:$0x3] %vm2575_vm3, %v3291_v24 }
0x1a36   :  { %3641 = shalt.err (!%p3638_p3)
}
0x1a37   :  { %s3642_s13 = scalar_lea.hbm %s4267_s11, 32 }
0x1a38   :  { %p3643_p4 = scmp.ne.s32.totalorder %s4267_s11, %s3642_s13  ;;  %p3646_p5 = scmp.lt.u32.totalorder %s3642_s13, %s4267_s11 }
0x1a3a   :  { %p3648_p6 = pnand %p3646_p5, %p3643_p4 }
0x1a3c   :  { %3651 = shalt.err (!%p3648_p6)
}
0x1a3d   :  { %2601 = dma.vmem_to_hbm [thread:$0]  %s2599_s2, 32, %s4267_s11, [#allocation4]  }
0x1a3e   :  { %3662 = dma.done.wait [#allocation4], 32  }
0x1a3f   :  { %3663 = vsyncadd [#allocation4], 4294967264 }
0x1a40   :  { %3664 = dma.done.wait [#allocation17], 128  }
0x1a41   :  { %3665 = vsyncadd [#allocation17], 4294967168 }
0x1a42   :  { %2635 = vsyncpa [#allocation3], 1 }
0x1a43   :  { %2636 = vsyncpa [#allocation8], 1 }
0x1a44   :  { %2637 = vsyncpa [#allocation11], 1 }
0x1a45   :  { %2638 = vsyncpa [#allocation14], 1 }
0x1a46   :  { %2639 = vsyncpa [#allocation4], 1 }
0x1a47   :  { %2640 = vsyncpa [#allocation17], 1 }
0x1a48   :  { %2641 = vsyncpa [#allocation5], 1 }

</bundles_post_ra>
